<compile_context>
chip_gen: v5e
topology: v5e:2x2
jax: 0.10.0
libtpu: 0.0.40
codegen_flags: <defaults>
</compile_context>

<pallas_src>
import functools

import jax
import jax.numpy as jnp
from jax.experimental import pallas as pl
from jax.experimental.pallas import tpu as pltpu


CFG = dict(vocab=100, type_vocab=2, max_pos=16, hidden=32, heads=2,
           layers=2, intermediate=64, num_labels=3)


# --------------------------- fused model kernel -----------------------------

def _nli_fused_kernel(emb_ref, maskb_ref, eg_ref, eb_ref,
                      qkvw_ref, qkvb_ref, aow_ref, aob_ref, l1g_ref, l1b_ref,
                      iw_ref, ib_ref, ow_ref, ob_ref, l2g_ref, l2b_ref,
                      pw_ref, pb_ref, cw_ref, cb_ref,
                      out_ref,
                      *, num_layers, B, S, H, nh, eps):
    """Whole BERT encoder + pooler + classifier + softmax, VMEM-resident."""
    dh = H // nh
    scale = 1.0 / (dh ** 0.5)

    def layernorm(z, g, b):
        mu = jnp.mean(z, axis=-1, keepdims=True)
        d = z - mu
        var = jnp.mean(d * d, axis=-1, keepdims=True)
        return d * jax.lax.rsqrt(var + eps) * g + b

    def gelu(y):
        # TODO(synk): HF BERT default is erf-based gelu; tanh approximation used here.
        c = 0.7978845608028654  # sqrt(2/pi)
        return 0.5 * y * (1.0 + jnp.tanh(c * (y + 0.044715 * y * y * y)))

    # Embedding LayerNorm (no residual / no zeros array).
    h = layernorm(emb_ref[...], eg_ref[...], eb_ref[...])          # (B*S, H)

    for l in range(num_layers):                                     # static unroll
        x = h

        # Fused QKV projection: one matmul, lane width 3H.
        qkv = jnp.dot(x, qkvw_ref[l],
                      preferred_element_type=jnp.float32) + qkvb_ref[l]   # (B*S, 3H)

        # Self-attention, static loops over (batch, head); all values in vregs.
        ctx_rows = []
        for b in range(B):
            bias = maskb_ref[b:b + 1, :]                             # (1, S) additive
            row = qkv[b * S:(b + 1) * S, :]                          # (S, 3H)
            heads = []
            for hh in range(nh):
                q_ = row[:, hh * dh:(hh + 1) * dh]                   # (S, dh)
                k_ = row[:, H + hh * dh:H + (hh + 1) * dh]
                v_ = row[:, 2 * H + hh * dh:2 * H + (hh + 1) * dh]
                s = jnp.dot(q_, k_.T,
                            preferred_element_type=jnp.float32) * scale + bias
                m = jnp.max(s, axis=-1, keepdims=True)
                p = jnp.exp(s - m)
                p = p / jnp.sum(p, axis=-1, keepdims=True)
                heads.append(jnp.dot(p, v_, preferred_element_type=jnp.float32))
            ctx_rows.append(jnp.concatenate(heads, axis=-1))         # (S, H)
        ctx = jnp.concatenate(ctx_rows, axis=0)                      # (B*S, H)

        # Attention output projection + add & LN.
        attn_out = jnp.dot(ctx, aow_ref[l],
                           preferred_element_type=jnp.float32) + aob_ref[l]
        h = layernorm(attn_out + x, l1g_ref[l], l1b_ref[l])

        # FFN: up-proj + gelu, down-proj, add & LN.
        inter = gelu(jnp.dot(h, iw_ref[l],
                             preferred_element_type=jnp.float32) + ib_ref[l])
        ffn = jnp.dot(inter, ow_ref[l],
                      preferred_element_type=jnp.float32) + ob_ref[l]
        h = layernorm(ffn + h, l2g_ref[l], l2b_ref[l])

    # Pooler (tanh on [CLS]) -> classifier -> softmax(dim=1), fused tail.
    cls_tok = jnp.concatenate([h[b * S:b * S + 1, :] for b in range(B)], axis=0)  # (B, H)
    pooled = jnp.tanh(jnp.dot(cls_tok, pw_ref[...],
                              preferred_element_type=jnp.float32) + pb_ref[...])
    logits = jnp.dot(pooled, cw_ref[...],
                     preferred_element_type=jnp.float32) + cb_ref[...]            # (B, L)
    m = jnp.max(logits, axis=1, keepdims=True)
    e = jnp.exp(logits - m)
    out_ref[...] = e / jnp.sum(e, axis=1, keepdims=True)


# ------------------------------- parameters ---------------------------------

def init_params(key, cfg):
    H, I, L = cfg["hidden"], cfg["intermediate"], cfg["num_labels"]

    def w(key, shape, scale=0.02):
        return scale * jax.random.normal(key, shape, dtype=jnp.float32)

    keys = iter(jax.random.split(key, 64))
    params = {
        "word_emb": w(next(keys), (cfg["vocab"], H)),
        "pos_emb": w(next(keys), (cfg["max_pos"], H)),
        "tok_emb": w(next(keys), (cfg["type_vocab"], H)),
        "emb_ln_g": jnp.ones((H,), jnp.float32),
        "emb_ln_b": jnp.zeros((H,), jnp.float32),
        "pool_w": w(next(keys), (H, H)), "pool_b": jnp.zeros((H,), jnp.float32),
        "cls_w": w(next(keys), (H, L)), "cls_b": jnp.zeros((L,), jnp.float32),
        "layers": [],
    }
    for _ in range(cfg["layers"]):
        params["layers"].append({
            "q_w": w(next(keys), (H, H)), "q_b": jnp.zeros((H,), jnp.float32),
            "k_w": w(next(keys), (H, H)), "k_b": jnp.zeros((H,), jnp.float32),
            "v_w": w(next(keys), (H, H)), "v_b": jnp.zeros((H,), jnp.float32),
            "ao_w": w(next(keys), (H, H)), "ao_b": jnp.zeros((H,), jnp.float32),
            "attn_ln_g": jnp.ones((H,), jnp.float32),
            "attn_ln_b": jnp.zeros((H,), jnp.float32),
            "i_w": w(next(keys), (H, I)), "i_b": jnp.zeros((I,), jnp.float32),
            "o_w": w(next(keys), (I, H)), "o_b": jnp.zeros((H,), jnp.float32),
            "ffn_ln_g": jnp.ones((H,), jnp.float32),
            "ffn_ln_b": jnp.zeros((H,), jnp.float32),
        })
    return params


def _stack_layer_params(layers):
    """Stack per-layer weights so the fused kernel can index them by layer."""
    qkv_w = jnp.stack([jnp.concatenate([l["q_w"], l["k_w"], l["v_w"]], axis=1)
                       for l in layers])                               # (L, H, 3H)
    qkv_b = jnp.stack([jnp.concatenate([l["q_b"], l["k_b"], l["v_b"]])[None, :]
                       for l in layers])                               # (L, 1, 3H)
    ao_w = jnp.stack([l["ao_w"] for l in layers])                      # (L, H, H)
    ao_b = jnp.stack([l["ao_b"][None, :] for l in layers])             # (L, 1, H)
    l1g = jnp.stack([l["attn_ln_g"][None, :] for l in layers])
    l1b = jnp.stack([l["attn_ln_b"][None, :] for l in layers])
    i_w = jnp.stack([l["i_w"] for l in layers])                        # (L, H, I)
    i_b = jnp.stack([l["i_b"][None, :] for l in layers])               # (L, 1, I)
    o_w = jnp.stack([l["o_w"] for l in layers])                        # (L, I, H)
    o_b = jnp.stack([l["o_b"][None, :] for l in layers])               # (L, 1, H)
    l2g = jnp.stack([l["ffn_ln_g"][None, :] for l in layers])
    l2b = jnp.stack([l["ffn_ln_b"][None, :] for l in layers])
    return qkv_w, qkv_b, ao_w, ao_b, l1g, l1b, i_w, i_b, o_w, o_b, l2g, l2b


# -------------------------------- forward -----------------------------------

def nli_forward(params, input_ids, attention_mask, token_type_ids, cfg=CFG):
    """Equivalent of NLIModel.forward: BERT -> pooler -> classifier -> softmax(dim=1)."""
    B, S = input_ids.shape
    H, nh, L = cfg["hidden"], cfg["heads"], cfg["num_labels"]

    # Embedding gathers are wrapper-side glue (table lookups).
    emb = (params["word_emb"][input_ids]
           + params["pos_emb"][jnp.arange(S)][None, :, :]
           + params["tok_emb"][token_type_ids]).reshape(B * S, H)

    # Precompute additive mask bias once, reused for all layers/heads.
    mask_bias = (1.0 - attention_mask.astype(jnp.float32)) * (-1e9)    # (B, S)

    stacked = _stack_layer_params(params["layers"])

    vmem = pl.BlockSpec(memory_space=pltpu.MemorySpace.VMEM)
    kernel = functools.partial(_nli_fused_kernel,
                               num_layers=cfg["layers"], B=B, S=S, H=H, nh=nh,
                               eps=1e-12)

    probs = pl.pallas_call(
        kernel,
        out_shape=jax.ShapeDtypeStruct((B, L), jnp.float32),
        in_specs=[vmem] * 20,
        out_specs=vmem,
    )(emb, mask_bias,
      params["emb_ln_g"][None, :], params["emb_ln_b"][None, :],
      *stacked,
      params["pool_w"], params["pool_b"][None, :],
      params["cls_w"], params["cls_b"][None, :])
    return probs


# --------------------------------- main --------------------------------------

if __name__ == "__main__":
    B, S = 2, 8
    key = jax.random.PRNGKey(0)
    k_params, k_ids, k_types = jax.random.split(key, 3)

    params = init_params(k_params, CFG)
    input_ids = jax.random.randint(k_ids, (B, S), 0, CFG["vocab"], dtype=jnp.int32)
    token_type_ids = jax.random.randint(k_types, (B, S), 0, CFG["type_vocab"], dtype=jnp.int32)
    # Mask out the last two tokens of the second sequence (1 = attend, 0 = pad).
    attention_mask = jnp.array([[1] * S, [1] * (S - 2) + [0] * 2], dtype=jnp.int32)

    probs = nli_forward(params, input_ids, attention_mask, token_type_ids)
    probs = jax.block_until_ready(probs)

    assert probs.shape == (B, CFG["num_labels"])
    assert bool(jnp.all(jnp.isfinite(probs)))
    assert bool(jnp.allclose(jnp.sum(probs, axis=1), 1.0, atol=1e-5))
    print("KERNEL_OK")
</pallas_src>

<mosaic_0001>
module attributes {stable_mosaic.version = 11 : i64} {
  func.func @_nli_fused_kernel(%arg0: memref<16x32xf32, #tpu.memory_space<vmem>>, %arg1: memref<2x8xf32, #tpu.memory_space<vmem>>, %arg2: memref<1x32xf32, #tpu.memory_space<vmem>>, %arg3: memref<1x32xf32, #tpu.memory_space<vmem>>, %arg4: memref<2x32x96xf32, #tpu.memory_space<vmem>>, %arg5: memref<2x1x96xf32, #tpu.memory_space<vmem>>, %arg6: memref<2x32x32xf32, #tpu.memory_space<vmem>>, %arg7: memref<2x1x32xf32, #tpu.memory_space<vmem>>, %arg8: memref<2x1x32xf32, #tpu.memory_space<vmem>>, %arg9: memref<2x1x32xf32, #tpu.memory_space<vmem>>, %arg10: memref<2x32x64xf32, #tpu.memory_space<vmem>>, %arg11: memref<2x1x64xf32, #tpu.memory_space<vmem>>, %arg12: memref<2x64x32xf32, #tpu.memory_space<vmem>>, %arg13: memref<2x1x32xf32, #tpu.memory_space<vmem>>, %arg14: memref<2x1x32xf32, #tpu.memory_space<vmem>>, %arg15: memref<2x1x32xf32, #tpu.memory_space<vmem>>, %arg16: memref<32x32xf32, #tpu.memory_space<vmem>>, %arg17: memref<1x32xf32, #tpu.memory_space<vmem>>, %arg18: memref<32x3xf32, #tpu.memory_space<vmem>>, %arg19: memref<1x3xf32, #tpu.memory_space<vmem>>, %arg20: memref<2x3xf32, #tpu.memory_space<vmem>>) attributes {dimension_semantics = [], scalar_prefetch = 0 : i64, scratch_operands = 0 : i64, tpu.core_type = #tpu.core_type<tc>} {
    %c0 = arith.constant 0 : index
    %c0_0 = arith.constant 0 : index
    %0 = vector.load %arg0[%c0, %c0_0] : memref<16x32xf32, #tpu.memory_space<vmem>>, vector<16x32xf32>
    %c0_1 = arith.constant 0 : index
    %c0_2 = arith.constant 0 : index
    %1 = vector.load %arg2[%c0_1, %c0_2] : memref<1x32xf32, #tpu.memory_space<vmem>>, vector<1x32xf32>
    %c0_3 = arith.constant 0 : index
    %c0_4 = arith.constant 0 : index
    %2 = vector.load %arg3[%c0_3, %c0_4] : memref<1x32xf32, #tpu.memory_space<vmem>>, vector<1x32xf32>
    %cst = arith.constant dense<0.000000e+00> : vector<16xf32>
    %3 = vector.multi_reduction <add>, %0, %cst [1] : vector<16x32xf32> to vector<16xf32>
    %4 = vector.shape_cast %3 : vector<16xf32> to vector<16x1xf32>
    %cst_5 = arith.constant 3.200000e+01 : f32
    %5 = vector.broadcast %cst_5 : f32 to vector<16x1xf32>
    %6 = arith.divf %4, %5 : vector<16x1xf32>
    %7 = vector.broadcast %6 : vector<16x1xf32> to vector<16x32xf32>
    %8 = arith.subf %0, %7 : vector<16x32xf32>
    %9 = arith.mulf %8, %8 : vector<16x32xf32>
    %cst_6 = arith.constant dense<0.000000e+00> : vector<16xf32>
    %10 = vector.multi_reduction <add>, %9, %cst_6 [1] : vector<16x32xf32> to vector<16xf32>
    %11 = vector.shape_cast %10 : vector<16xf32> to vector<16x1xf32>
    %cst_7 = arith.constant 3.200000e+01 : f32
    %12 = vector.broadcast %cst_7 : f32 to vector<16x1xf32>
    %13 = arith.divf %11, %12 : vector<16x1xf32>
    %cst_8 = arith.constant 9.99999996E-13 : f32
    %14 = vector.broadcast %cst_8 : f32 to vector<16x1xf32>
    %15 = arith.addf %13, %14 : vector<16x1xf32>
    %16 = math.rsqrt %15 : vector<16x1xf32>
    %17 = vector.broadcast %16 : vector<16x1xf32> to vector<16x32xf32>
    %18 = arith.mulf %8, %17 : vector<16x32xf32>
    %19 = vector.broadcast %1 : vector<1x32xf32> to vector<16x32xf32>
    %20 = arith.mulf %18, %19 : vector<16x32xf32>
    %21 = vector.broadcast %2 : vector<1x32xf32> to vector<16x32xf32>
    %22 = arith.addf %20, %21 : vector<16x32xf32>
    %c0_9 = arith.constant 0 : index
    %c0_10 = arith.constant 0 : index
    %c0_11 = arith.constant 0 : index
    %23 = vector.load %arg4[%c0_9, %c0_10, %c0_11] : memref<2x32x96xf32, #tpu.memory_space<vmem>>, vector<1x32x96xf32>
    %24 = vector.shape_cast %23 : vector<1x32x96xf32> to vector<32x96xf32>
    %cst_12 = arith.constant dense<0.000000e+00> : vector<16x96xf32>
    %25 = tpu.matmul %22, %24, %cst_12 {dimension_numbers = #tpu.dot_dimension_numbers<[1], [0], [0], [1], [0, 0, 1, 1], [], []>} : vector<16x32xf32>, vector<32x96xf32>, vector<16x96xf32> -> vector<16x96xf32>
    %c0_13 = arith.constant 0 : index
    %c0_14 = arith.constant 0 : index
    %c0_15 = arith.constant 0 : index
    %26 = vector.load %arg5[%c0_13, %c0_14, %c0_15] : memref<2x1x96xf32, #tpu.memory_space<vmem>>, vector<1x1x96xf32>
    %27 = vector.shape_cast %26 : vector<1x1x96xf32> to vector<1x96xf32>
    %28 = vector.broadcast %27 : vector<1x96xf32> to vector<16x96xf32>
    %29 = arith.addf %25, %28 : vector<16x96xf32>
    %c0_16 = arith.constant 0 : index
    %c0_17 = arith.constant 0 : index
    %30 = vector.load %arg1[%c0_16, %c0_17] : memref<2x8xf32, #tpu.memory_space<vmem>>, vector<1x8xf32>
    %31 = vector.extract_strided_slice %29 {offsets = [0, 0], sizes = [8, 96], strides = [1, 1]} : vector<16x96xf32> to vector<8x96xf32>
    %32 = vector.extract_strided_slice %31 {offsets = [0, 0], sizes = [8, 16], strides = [1, 1]} : vector<8x96xf32> to vector<8x16xf32>
    %33 = vector.extract_strided_slice %31 {offsets = [0, 32], sizes = [8, 16], strides = [1, 1]} : vector<8x96xf32> to vector<8x16xf32>
    %34 = vector.extract_strided_slice %31 {offsets = [0, 64], sizes = [8, 16], strides = [1, 1]} : vector<8x96xf32> to vector<8x16xf32>
    %35 = tpu.transpose %33, [1, 0] : vector<8x16xf32> -> vector<16x8xf32>
    %cst_18 = arith.constant dense<0.000000e+00> : vector<8x8xf32>
    %36 = tpu.matmul %32, %35, %cst_18 {dimension_numbers = #tpu.dot_dimension_numbers<[1], [0], [0], [1], [0, 0, 1, 1], [], []>} : vector<8x16xf32>, vector<16x8xf32>, vector<8x8xf32> -> vector<8x8xf32>
    %cst_19 = arith.constant 2.500000e-01 : f32
    %37 = vector.broadcast %cst_19 : f32 to vector<8x8xf32>
    %38 = arith.mulf %36, %37 : vector<8x8xf32>
    %39 = vector.broadcast %30 : vector<1x8xf32> to vector<8x8xf32>
    %40 = arith.addf %38, %39 : vector<8x8xf32>
    %cst_20 = arith.constant dense<0xFF800000> : vector<8xf32>
    %41 = vector.multi_reduction <maximumf>, %40, %cst_20 [1] : vector<8x8xf32> to vector<8xf32>
    %42 = vector.shape_cast %41 : vector<8xf32> to vector<8x1xf32>
    %43 = vector.broadcast %42 : vector<8x1xf32> to vector<8x8xf32>
    %44 = arith.subf %40, %43 : vector<8x8xf32>
    %45 = math.exp %44 : vector<8x8xf32>
    %cst_21 = arith.constant dense<0.000000e+00> : vector<8xf32>
    %46 = vector.multi_reduction <add>, %45, %cst_21 [1] : vector<8x8xf32> to vector<8xf32>
    %47 = vector.shape_cast %46 : vector<8xf32> to vector<8x1xf32>
    %48 = vector.broadcast %47 : vector<8x1xf32> to vector<8x8xf32>
    %49 = arith.divf %45, %48 : vector<8x8xf32>
    %cst_22 = arith.constant dense<0.000000e+00> : vector<8x16xf32>
    %50 = tpu.matmul %49, %34, %cst_22 {dimension_numbers = #tpu.dot_dimension_numbers<[1], [0], [0], [1], [0, 0, 1, 1], [], []>} : vector<8x8xf32>, vector<8x16xf32>, vector<8x16xf32> -> vector<8x16xf32>
    %51 = vector.extract_strided_slice %31 {offsets = [0, 16], sizes = [8, 16], strides = [1, 1]} : vector<8x96xf32> to vector<8x16xf32>
    %52 = vector.extract_strided_slice %31 {offsets = [0, 48], sizes = [8, 16], strides = [1, 1]} : vector<8x96xf32> to vector<8x16xf32>
    %53 = vector.extract_strided_slice %31 {offsets = [0, 80], sizes = [8, 16], strides = [1, 1]} : vector<8x96xf32> to vector<8x16xf32>
    %54 = tpu.transpose %52, [1, 0] : vector<8x16xf32> -> vector<16x8xf32>
    %cst_23 = arith.constant dense<0.000000e+00> : vector<8x8xf32>
    %55 = tpu.matmul %51, %54, %cst_23 {dimension_numbers = #tpu.dot_dimension_numbers<[1], [0], [0], [1], [0, 0, 1, 1], [], []>} : vector<8x16xf32>, vector<16x8xf32>, vector<8x8xf32> -> vector<8x8xf32>
    %cst_24 = arith.constant 2.500000e-01 : f32
    %56 = vector.broadcast %cst_24 : f32 to vector<8x8xf32>
    %57 = arith.mulf %55, %56 : vector<8x8xf32>
    %58 = vector.broadcast %30 : vector<1x8xf32> to vector<8x8xf32>
    %59 = arith.addf %57, %58 : vector<8x8xf32>
    %cst_25 = arith.constant dense<0xFF800000> : vector<8xf32>
    %60 = vector.multi_reduction <maximumf>, %59, %cst_25 [1] : vector<8x8xf32> to vector<8xf32>
    %61 = vector.shape_cast %60 : vector<8xf32> to vector<8x1xf32>
    %62 = vector.broadcast %61 : vector<8x1xf32> to vector<8x8xf32>
    %63 = arith.subf %59, %62 : vector<8x8xf32>
    %64 = math.exp %63 : vector<8x8xf32>
    %cst_26 = arith.constant dense<0.000000e+00> : vector<8xf32>
    %65 = vector.multi_reduction <add>, %64, %cst_26 [1] : vector<8x8xf32> to vector<8xf32>
    %66 = vector.shape_cast %65 : vector<8xf32> to vector<8x1xf32>
    %67 = vector.broadcast %66 : vector<8x1xf32> to vector<8x8xf32>
    %68 = arith.divf %64, %67 : vector<8x8xf32>
    %cst_27 = arith.constant dense<0.000000e+00> : vector<8x16xf32>
    %69 = tpu.matmul %68, %53, %cst_27 {dimension_numbers = #tpu.dot_dimension_numbers<[1], [0], [0], [1], [0, 0, 1, 1], [], []>} : vector<8x8xf32>, vector<8x16xf32>, vector<8x16xf32> -> vector<8x16xf32>
    %70 = tpu.concatenate %50, %69 in 1 : vector<8x16xf32>, vector<8x16xf32> -> vector<8x32xf32>
    %c1 = arith.constant 1 : index
    %c0_28 = arith.constant 0 : index
    %71 = vector.load %arg1[%c1, %c0_28] : memref<2x8xf32, #tpu.memory_space<vmem>>, vector<1x8xf32>
    %72 = vector.extract_strided_slice %29 {offsets = [8, 0], sizes = [8, 96], strides = [1, 1]} : vector<16x96xf32> to vector<8x96xf32>
    %73 = vector.extract_strided_slice %72 {offsets = [0, 0], sizes = [8, 16], strides = [1, 1]} : vector<8x96xf32> to vector<8x16xf32>
    %74 = vector.extract_strided_slice %72 {offsets = [0, 32], sizes = [8, 16], strides = [1, 1]} : vector<8x96xf32> to vector<8x16xf32>
    %75 = vector.extract_strided_slice %72 {offsets = [0, 64], sizes = [8, 16], strides = [1, 1]} : vector<8x96xf32> to vector<8x16xf32>
    %76 = tpu.transpose %74, [1, 0] : vector<8x16xf32> -> vector<16x8xf32>
    %cst_29 = arith.constant dense<0.000000e+00> : vector<8x8xf32>
    %77 = tpu.matmul %73, %76, %cst_29 {dimension_numbers = #tpu.dot_dimension_numbers<[1], [0], [0], [1], [0, 0, 1, 1], [], []>} : vector<8x16xf32>, vector<16x8xf32>, vector<8x8xf32> -> vector<8x8xf32>
    %cst_30 = arith.constant 2.500000e-01 : f32
    %78 = vector.broadcast %cst_30 : f32 to vector<8x8xf32>
    %79 = arith.mulf %77, %78 : vector<8x8xf32>
    %80 = vector.broadcast %71 : vector<1x8xf32> to vector<8x8xf32>
    %81 = arith.addf %79, %80 : vector<8x8xf32>
    %cst_31 = arith.constant dense<0xFF800000> : vector<8xf32>
    %82 = vector.multi_reduction <maximumf>, %81, %cst_31 [1] : vector<8x8xf32> to vector<8xf32>
    %83 = vector.shape_cast %82 : vector<8xf32> to vector<8x1xf32>
    %84 = vector.broadcast %83 : vector<8x1xf32> to vector<8x8xf32>
    %85 = arith.subf %81, %84 : vector<8x8xf32>
    %86 = math.exp %85 : vector<8x8xf32>
    %cst_32 = arith.constant dense<0.000000e+00> : vector<8xf32>
    %87 = vector.multi_reduction <add>, %86, %cst_32 [1] : vector<8x8xf32> to vector<8xf32>
    %88 = vector.shape_cast %87 : vector<8xf32> to vector<8x1xf32>
    %89 = vector.broadcast %88 : vector<8x1xf32> to vector<8x8xf32>
    %90 = arith.divf %86, %89 : vector<8x8xf32>
    %cst_33 = arith.constant dense<0.000000e+00> : vector<8x16xf32>
    %91 = tpu.matmul %90, %75, %cst_33 {dimension_numbers = #tpu.dot_dimension_numbers<[1], [0], [0], [1], [0, 0, 1, 1], [], []>} : vector<8x8xf32>, vector<8x16xf32>, vector<8x16xf32> -> vector<8x16xf32>
    %92 = vector.extract_strided_slice %72 {offsets = [0, 16], sizes = [8, 16], strides = [1, 1]} : vector<8x96xf32> to vector<8x16xf32>
    %93 = vector.extract_strided_slice %72 {offsets = [0, 48], sizes = [8, 16], strides = [1, 1]} : vector<8x96xf32> to vector<8x16xf32>
    %94 = vector.extract_strided_slice %72 {offsets = [0, 80], sizes = [8, 16], strides = [1, 1]} : vector<8x96xf32> to vector<8x16xf32>
    %95 = tpu.transpose %93, [1, 0] : vector<8x16xf32> -> vector<16x8xf32>
    %cst_34 = arith.constant dense<0.000000e+00> : vector<8x8xf32>
    %96 = tpu.matmul %92, %95, %cst_34 {dimension_numbers = #tpu.dot_dimension_numbers<[1], [0], [0], [1], [0, 0, 1, 1], [], []>} : vector<8x16xf32>, vector<16x8xf32>, vector<8x8xf32> -> vector<8x8xf32>
    %cst_35 = arith.constant 2.500000e-01 : f32
    %97 = vector.broadcast %cst_35 : f32 to vector<8x8xf32>
    %98 = arith.mulf %96, %97 : vector<8x8xf32>
    %99 = vector.broadcast %71 : vector<1x8xf32> to vector<8x8xf32>
    %100 = arith.addf %98, %99 : vector<8x8xf32>
    %cst_36 = arith.constant dense<0xFF800000> : vector<8xf32>
    %101 = vector.multi_reduction <maximumf>, %100, %cst_36 [1] : vector<8x8xf32> to vector<8xf32>
    %102 = vector.shape_cast %101 : vector<8xf32> to vector<8x1xf32>
    %103 = vector.broadcast %102 : vector<8x1xf32> to vector<8x8xf32>
    %104 = arith.subf %100, %103 : vector<8x8xf32>
    %105 = math.exp %104 : vector<8x8xf32>
    %cst_37 = arith.constant dense<0.000000e+00> : vector<8xf32>
    %106 = vector.multi_reduction <add>, %105, %cst_37 [1] : vector<8x8xf32> to vector<8xf32>
    %107 = vector.shape_cast %106 : vector<8xf32> to vector<8x1xf32>
    %108 = vector.broadcast %107 : vector<8x1xf32> to vector<8x8xf32>
    %109 = arith.divf %105, %108 : vector<8x8xf32>
    %cst_38 = arith.constant dense<0.000000e+00> : vector<8x16xf32>
    %110 = tpu.matmul %109, %94, %cst_38 {dimension_numbers = #tpu.dot_dimension_numbers<[1], [0], [0], [1], [0, 0, 1, 1], [], []>} : vector<8x8xf32>, vector<8x16xf32>, vector<8x16xf32> -> vector<8x16xf32>
    %111 = tpu.concatenate %91, %110 in 1 : vector<8x16xf32>, vector<8x16xf32> -> vector<8x32xf32>
    %112 = tpu.concatenate %70, %111 in 0 : vector<8x32xf32>, vector<8x32xf32> -> vector<16x32xf32>
    %c0_39 = arith.constant 0 : index
    %c0_40 = arith.constant 0 : index
    %c0_41 = arith.constant 0 : index
    %113 = vector.load %arg6[%c0_39, %c0_40, %c0_41] : memref<2x32x32xf32, #tpu.memory_space<vmem>>, vector<1x32x32xf32>
    %114 = vector.shape_cast %113 : vector<1x32x32xf32> to vector<32x32xf32>
    %cst_42 = arith.constant dense<0.000000e+00> : vector<16x32xf32>
    %115 = tpu.matmul %112, %114, %cst_42 {dimension_numbers = #tpu.dot_dimension_numbers<[1], [0], [0], [1], [0, 0, 1, 1], [], []>} : vector<16x32xf32>, vector<32x32xf32>, vector<16x32xf32> -> vector<16x32xf32>
    %c0_43 = arith.constant 0 : index
    %c0_44 = arith.constant 0 : index
    %c0_45 = arith.constant 0 : index
    %116 = vector.load %arg7[%c0_43, %c0_44, %c0_45] : memref<2x1x32xf32, #tpu.memory_space<vmem>>, vector<1x1x32xf32>
    %117 = vector.shape_cast %116 : vector<1x1x32xf32> to vector<1x32xf32>
    %118 = vector.broadcast %117 : vector<1x32xf32> to vector<16x32xf32>
    %119 = arith.addf %115, %118 : vector<16x32xf32>
    %120 = arith.addf %119, %22 : vector<16x32xf32>
    %c0_46 = arith.constant 0 : index
    %c0_47 = arith.constant 0 : index
    %c0_48 = arith.constant 0 : index
    %121 = vector.load %arg8[%c0_46, %c0_47, %c0_48] : memref<2x1x32xf32, #tpu.memory_space<vmem>>, vector<1x1x32xf32>
    %122 = vector.shape_cast %121 : vector<1x1x32xf32> to vector<1x32xf32>
    %c0_49 = arith.constant 0 : index
    %c0_50 = arith.constant 0 : index
    %c0_51 = arith.constant 0 : index
    %123 = vector.load %arg9[%c0_49, %c0_50, %c0_51] : memref<2x1x32xf32, #tpu.memory_space<vmem>>, vector<1x1x32xf32>
    %124 = vector.shape_cast %123 : vector<1x1x32xf32> to vector<1x32xf32>
    %cst_52 = arith.constant dense<0.000000e+00> : vector<16xf32>
    %125 = vector.multi_reduction <add>, %120, %cst_52 [1] : vector<16x32xf32> to vector<16xf32>
    %126 = vector.shape_cast %125 : vector<16xf32> to vector<16x1xf32>
    %cst_53 = arith.constant 3.200000e+01 : f32
    %127 = vector.broadcast %cst_53 : f32 to vector<16x1xf32>
    %128 = arith.divf %126, %127 : vector<16x1xf32>
    %129 = vector.broadcast %128 : vector<16x1xf32> to vector<16x32xf32>
    %130 = arith.subf %120, %129 : vector<16x32xf32>
    %131 = arith.mulf %130, %130 : vector<16x32xf32>
    %cst_54 = arith.constant dense<0.000000e+00> : vector<16xf32>
    %132 = vector.multi_reduction <add>, %131, %cst_54 [1] : vector<16x32xf32> to vector<16xf32>
    %133 = vector.shape_cast %132 : vector<16xf32> to vector<16x1xf32>
    %cst_55 = arith.constant 3.200000e+01 : f32
    %134 = vector.broadcast %cst_55 : f32 to vector<16x1xf32>
    %135 = arith.divf %133, %134 : vector<16x1xf32>
    %cst_56 = arith.constant 9.99999996E-13 : f32
    %136 = vector.broadcast %cst_56 : f32 to vector<16x1xf32>
    %137 = arith.addf %135, %136 : vector<16x1xf32>
    %138 = math.rsqrt %137 : vector<16x1xf32>
    %139 = vector.broadcast %138 : vector<16x1xf32> to vector<16x32xf32>
    %140 = arith.mulf %130, %139 : vector<16x32xf32>
    %141 = vector.broadcast %122 : vector<1x32xf32> to vector<16x32xf32>
    %142 = arith.mulf %140, %141 : vector<16x32xf32>
    %143 = vector.broadcast %124 : vector<1x32xf32> to vector<16x32xf32>
    %144 = arith.addf %142, %143 : vector<16x32xf32>
    %c0_57 = arith.constant 0 : index
    %c0_58 = arith.constant 0 : index
    %c0_59 = arith.constant 0 : index
    %145 = vector.load %arg10[%c0_57, %c0_58, %c0_59] : memref<2x32x64xf32, #tpu.memory_space<vmem>>, vector<1x32x64xf32>
    %146 = vector.shape_cast %145 : vector<1x32x64xf32> to vector<32x64xf32>
    %cst_60 = arith.constant dense<0.000000e+00> : vector<16x64xf32>
    %147 = tpu.matmul %144, %146, %cst_60 {dimension_numbers = #tpu.dot_dimension_numbers<[1], [0], [0], [1], [0, 0, 1, 1], [], []>} : vector<16x32xf32>, vector<32x64xf32>, vector<16x64xf32> -> vector<16x64xf32>
    %c0_61 = arith.constant 0 : index
    %c0_62 = arith.constant 0 : index
    %c0_63 = arith.constant 0 : index
    %148 = vector.load %arg11[%c0_61, %c0_62, %c0_63] : memref<2x1x64xf32, #tpu.memory_space<vmem>>, vector<1x1x64xf32>
    %149 = vector.shape_cast %148 : vector<1x1x64xf32> to vector<1x64xf32>
    %150 = vector.broadcast %149 : vector<1x64xf32> to vector<16x64xf32>
    %151 = arith.addf %147, %150 : vector<16x64xf32>
    %cst_64 = arith.constant 5.000000e-01 : f32
    %152 = vector.broadcast %cst_64 : f32 to vector<16x64xf32>
    %153 = arith.mulf %152, %151 : vector<16x64xf32>
    %cst_65 = arith.constant 4.471500e-02 : f32
    %154 = vector.broadcast %cst_65 : f32 to vector<16x64xf32>
    %155 = arith.mulf %154, %151 : vector<16x64xf32>
    %156 = arith.mulf %155, %151 : vector<16x64xf32>
    %157 = arith.mulf %156, %151 : vector<16x64xf32>
    %158 = arith.addf %151, %157 : vector<16x64xf32>
    %cst_66 = arith.constant 0.797884583 : f32
    %159 = vector.broadcast %cst_66 : f32 to vector<16x64xf32>
    %160 = arith.mulf %159, %158 : vector<16x64xf32>
    %161 = math.tanh %160 : vector<16x64xf32>
    %cst_67 = arith.constant 1.000000e+00 : f32
    %162 = vector.broadcast %cst_67 : f32 to vector<16x64xf32>
    %163 = arith.addf %162, %161 : vector<16x64xf32>
    %164 = arith.mulf %153, %163 : vector<16x64xf32>
    %c0_68 = arith.constant 0 : index
    %c0_69 = arith.constant 0 : index
    %c0_70 = arith.constant 0 : index
    %165 = vector.load %arg12[%c0_68, %c0_69, %c0_70] : memref<2x64x32xf32, #tpu.memory_space<vmem>>, vector<1x64x32xf32>
    %166 = vector.shape_cast %165 : vector<1x64x32xf32> to vector<64x32xf32>
    %cst_71 = arith.constant dense<0.000000e+00> : vector<16x32xf32>
    %167 = tpu.matmul %164, %166, %cst_71 {dimension_numbers = #tpu.dot_dimension_numbers<[1], [0], [0], [1], [0, 0, 1, 1], [], []>} : vector<16x64xf32>, vector<64x32xf32>, vector<16x32xf32> -> vector<16x32xf32>
    %c0_72 = arith.constant 0 : index
    %c0_73 = arith.constant 0 : index
    %c0_74 = arith.constant 0 : index
    %168 = vector.load %arg13[%c0_72, %c0_73, %c0_74] : memref<2x1x32xf32, #tpu.memory_space<vmem>>, vector<1x1x32xf32>
    %169 = vector.shape_cast %168 : vector<1x1x32xf32> to vector<1x32xf32>
    %170 = vector.broadcast %169 : vector<1x32xf32> to vector<16x32xf32>
    %171 = arith.addf %167, %170 : vector<16x32xf32>
    %172 = arith.addf %171, %144 : vector<16x32xf32>
    %c0_75 = arith.constant 0 : index
    %c0_76 = arith.constant 0 : index
    %c0_77 = arith.constant 0 : index
    %173 = vector.load %arg14[%c0_75, %c0_76, %c0_77] : memref<2x1x32xf32, #tpu.memory_space<vmem>>, vector<1x1x32xf32>
    %174 = vector.shape_cast %173 : vector<1x1x32xf32> to vector<1x32xf32>
    %c0_78 = arith.constant 0 : index
    %c0_79 = arith.constant 0 : index
    %c0_80 = arith.constant 0 : index
    %175 = vector.load %arg15[%c0_78, %c0_79, %c0_80] : memref<2x1x32xf32, #tpu.memory_space<vmem>>, vector<1x1x32xf32>
    %176 = vector.shape_cast %175 : vector<1x1x32xf32> to vector<1x32xf32>
    %cst_81 = arith.constant dense<0.000000e+00> : vector<16xf32>
    %177 = vector.multi_reduction <add>, %172, %cst_81 [1] : vector<16x32xf32> to vector<16xf32>
    %178 = vector.shape_cast %177 : vector<16xf32> to vector<16x1xf32>
    %cst_82 = arith.constant 3.200000e+01 : f32
    %179 = vector.broadcast %cst_82 : f32 to vector<16x1xf32>
    %180 = arith.divf %178, %179 : vector<16x1xf32>
    %181 = vector.broadcast %180 : vector<16x1xf32> to vector<16x32xf32>
    %182 = arith.subf %172, %181 : vector<16x32xf32>
    %183 = arith.mulf %182, %182 : vector<16x32xf32>
    %cst_83 = arith.constant dense<0.000000e+00> : vector<16xf32>
    %184 = vector.multi_reduction <add>, %183, %cst_83 [1] : vector<16x32xf32> to vector<16xf32>
    %185 = vector.shape_cast %184 : vector<16xf32> to vector<16x1xf32>
    %cst_84 = arith.constant 3.200000e+01 : f32
    %186 = vector.broadcast %cst_84 : f32 to vector<16x1xf32>
    %187 = arith.divf %185, %186 : vector<16x1xf32>
    %cst_85 = arith.constant 9.99999996E-13 : f32
    %188 = vector.broadcast %cst_85 : f32 to vector<16x1xf32>
    %189 = arith.addf %187, %188 : vector<16x1xf32>
    %190 = math.rsqrt %189 : vector<16x1xf32>
    %191 = vector.broadcast %190 : vector<16x1xf32> to vector<16x32xf32>
    %192 = arith.mulf %182, %191 : vector<16x32xf32>
    %193 = vector.broadcast %174 : vector<1x32xf32> to vector<16x32xf32>
    %194 = arith.mulf %192, %193 : vector<16x32xf32>
    %195 = vector.broadcast %176 : vector<1x32xf32> to vector<16x32xf32>
    %196 = arith.addf %194, %195 : vector<16x32xf32>
    %c1_86 = arith.constant 1 : index
    %c0_87 = arith.constant 0 : index
    %c0_88 = arith.constant 0 : index
    %197 = vector.load %arg4[%c1_86, %c0_87, %c0_88] : memref<2x32x96xf32, #tpu.memory_space<vmem>>, vector<1x32x96xf32>
    %198 = vector.shape_cast %197 : vector<1x32x96xf32> to vector<32x96xf32>
    %cst_89 = arith.constant dense<0.000000e+00> : vector<16x96xf32>
    %199 = tpu.matmul %196, %198, %cst_89 {dimension_numbers = #tpu.dot_dimension_numbers<[1], [0], [0], [1], [0, 0, 1, 1], [], []>} : vector<16x32xf32>, vector<32x96xf32>, vector<16x96xf32> -> vector<16x96xf32>
    %c1_90 = arith.constant 1 : index
    %c0_91 = arith.constant 0 : index
    %c0_92 = arith.constant 0 : index
    %200 = vector.load %arg5[%c1_90, %c0_91, %c0_92] : memref<2x1x96xf32, #tpu.memory_space<vmem>>, vector<1x1x96xf32>
    %201 = vector.shape_cast %200 : vector<1x1x96xf32> to vector<1x96xf32>
    %202 = vector.broadcast %201 : vector<1x96xf32> to vector<16x96xf32>
    %203 = arith.addf %199, %202 : vector<16x96xf32>
    %c0_93 = arith.constant 0 : index
    %c0_94 = arith.constant 0 : index
    %204 = vector.load %arg1[%c0_93, %c0_94] : memref<2x8xf32, #tpu.memory_space<vmem>>, vector<1x8xf32>
    %205 = vector.extract_strided_slice %203 {offsets = [0, 0], sizes = [8, 96], strides = [1, 1]} : vector<16x96xf32> to vector<8x96xf32>
    %206 = vector.extract_strided_slice %205 {offsets = [0, 0], sizes = [8, 16], strides = [1, 1]} : vector<8x96xf32> to vector<8x16xf32>
    %207 = vector.extract_strided_slice %205 {offsets = [0, 32], sizes = [8, 16], strides = [1, 1]} : vector<8x96xf32> to vector<8x16xf32>
    %208 = vector.extract_strided_slice %205 {offsets = [0, 64], sizes = [8, 16], strides = [1, 1]} : vector<8x96xf32> to vector<8x16xf32>
    %209 = tpu.transpose %207, [1, 0] : vector<8x16xf32> -> vector<16x8xf32>
    %cst_95 = arith.constant dense<0.000000e+00> : vector<8x8xf32>
    %210 = tpu.matmul %206, %209, %cst_95 {dimension_numbers = #tpu.dot_dimension_numbers<[1], [0], [0], [1], [0, 0, 1, 1], [], []>} : vector<8x16xf32>, vector<16x8xf32>, vector<8x8xf32> -> vector<8x8xf32>
    %cst_96 = arith.constant 2.500000e-01 : f32
    %211 = vector.broadcast %cst_96 : f32 to vector<8x8xf32>
    %212 = arith.mulf %210, %211 : vector<8x8xf32>
    %213 = vector.broadcast %204 : vector<1x8xf32> to vector<8x8xf32>
    %214 = arith.addf %212, %213 : vector<8x8xf32>
    %cst_97 = arith.constant dense<0xFF800000> : vector<8xf32>
    %215 = vector.multi_reduction <maximumf>, %214, %cst_97 [1] : vector<8x8xf32> to vector<8xf32>
    %216 = vector.shape_cast %215 : vector<8xf32> to vector<8x1xf32>
    %217 = vector.broadcast %216 : vector<8x1xf32> to vector<8x8xf32>
    %218 = arith.subf %214, %217 : vector<8x8xf32>
    %219 = math.exp %218 : vector<8x8xf32>
    %cst_98 = arith.constant dense<0.000000e+00> : vector<8xf32>
    %220 = vector.multi_reduction <add>, %219, %cst_98 [1] : vector<8x8xf32> to vector<8xf32>
    %221 = vector.shape_cast %220 : vector<8xf32> to vector<8x1xf32>
    %222 = vector.broadcast %221 : vector<8x1xf32> to vector<8x8xf32>
    %223 = arith.divf %219, %222 : vector<8x8xf32>
    %cst_99 = arith.constant dense<0.000000e+00> : vector<8x16xf32>
    %224 = tpu.matmul %223, %208, %cst_99 {dimension_numbers = #tpu.dot_dimension_numbers<[1], [0], [0], [1], [0, 0, 1, 1], [], []>} : vector<8x8xf32>, vector<8x16xf32>, vector<8x16xf32> -> vector<8x16xf32>
    %225 = vector.extract_strided_slice %205 {offsets = [0, 16], sizes = [8, 16], strides = [1, 1]} : vector<8x96xf32> to vector<8x16xf32>
    %226 = vector.extract_strided_slice %205 {offsets = [0, 48], sizes = [8, 16], strides = [1, 1]} : vector<8x96xf32> to vector<8x16xf32>
    %227 = vector.extract_strided_slice %205 {offsets = [0, 80], sizes = [8, 16], strides = [1, 1]} : vector<8x96xf32> to vector<8x16xf32>
    %228 = tpu.transpose %226, [1, 0] : vector<8x16xf32> -> vector<16x8xf32>
    %cst_100 = arith.constant dense<0.000000e+00> : vector<8x8xf32>
    %229 = tpu.matmul %225, %228, %cst_100 {dimension_numbers = #tpu.dot_dimension_numbers<[1], [0], [0], [1], [0, 0, 1, 1], [], []>} : vector<8x16xf32>, vector<16x8xf32>, vector<8x8xf32> -> vector<8x8xf32>
    %cst_101 = arith.constant 2.500000e-01 : f32
    %230 = vector.broadcast %cst_101 : f32 to vector<8x8xf32>
    %231 = arith.mulf %229, %230 : vector<8x8xf32>
    %232 = vector.broadcast %204 : vector<1x8xf32> to vector<8x8xf32>
    %233 = arith.addf %231, %232 : vector<8x8xf32>
    %cst_102 = arith.constant dense<0xFF800000> : vector<8xf32>
    %234 = vector.multi_reduction <maximumf>, %233, %cst_102 [1] : vector<8x8xf32> to vector<8xf32>
    %235 = vector.shape_cast %234 : vector<8xf32> to vector<8x1xf32>
    %236 = vector.broadcast %235 : vector<8x1xf32> to vector<8x8xf32>
    %237 = arith.subf %233, %236 : vector<8x8xf32>
    %238 = math.exp %237 : vector<8x8xf32>
    %cst_103 = arith.constant dense<0.000000e+00> : vector<8xf32>
    %239 = vector.multi_reduction <add>, %238, %cst_103 [1] : vector<8x8xf32> to vector<8xf32>
    %240 = vector.shape_cast %239 : vector<8xf32> to vector<8x1xf32>
    %241 = vector.broadcast %240 : vector<8x1xf32> to vector<8x8xf32>
    %242 = arith.divf %238, %241 : vector<8x8xf32>
    %cst_104 = arith.constant dense<0.000000e+00> : vector<8x16xf32>
    %243 = tpu.matmul %242, %227, %cst_104 {dimension_numbers = #tpu.dot_dimension_numbers<[1], [0], [0], [1], [0, 0, 1, 1], [], []>} : vector<8x8xf32>, vector<8x16xf32>, vector<8x16xf32> -> vector<8x16xf32>
    %244 = tpu.concatenate %224, %243 in 1 : vector<8x16xf32>, vector<8x16xf32> -> vector<8x32xf32>
    %c1_105 = arith.constant 1 : index
    %c0_106 = arith.constant 0 : index
    %245 = vector.load %arg1[%c1_105, %c0_106] : memref<2x8xf32, #tpu.memory_space<vmem>>, vector<1x8xf32>
    %246 = vector.extract_strided_slice %203 {offsets = [8, 0], sizes = [8, 96], strides = [1, 1]} : vector<16x96xf32> to vector<8x96xf32>
    %247 = vector.extract_strided_slice %246 {offsets = [0, 0], sizes = [8, 16], strides = [1, 1]} : vector<8x96xf32> to vector<8x16xf32>
    %248 = vector.extract_strided_slice %246 {offsets = [0, 32], sizes = [8, 16], strides = [1, 1]} : vector<8x96xf32> to vector<8x16xf32>
    %249 = vector.extract_strided_slice %246 {offsets = [0, 64], sizes = [8, 16], strides = [1, 1]} : vector<8x96xf32> to vector<8x16xf32>
    %250 = tpu.transpose %248, [1, 0] : vector<8x16xf32> -> vector<16x8xf32>
    %cst_107 = arith.constant dense<0.000000e+00> : vector<8x8xf32>
    %251 = tpu.matmul %247, %250, %cst_107 {dimension_numbers = #tpu.dot_dimension_numbers<[1], [0], [0], [1], [0, 0, 1, 1], [], []>} : vector<8x16xf32>, vector<16x8xf32>, vector<8x8xf32> -> vector<8x8xf32>
    %cst_108 = arith.constant 2.500000e-01 : f32
    %252 = vector.broadcast %cst_108 : f32 to vector<8x8xf32>
    %253 = arith.mulf %251, %252 : vector<8x8xf32>
    %254 = vector.broadcast %245 : vector<1x8xf32> to vector<8x8xf32>
    %255 = arith.addf %253, %254 : vector<8x8xf32>
    %cst_109 = arith.constant dense<0xFF800000> : vector<8xf32>
    %256 = vector.multi_reduction <maximumf>, %255, %cst_109 [1] : vector<8x8xf32> to vector<8xf32>
    %257 = vector.shape_cast %256 : vector<8xf32> to vector<8x1xf32>
    %258 = vector.broadcast %257 : vector<8x1xf32> to vector<8x8xf32>
    %259 = arith.subf %255, %258 : vector<8x8xf32>
    %260 = math.exp %259 : vector<8x8xf32>
    %cst_110 = arith.constant dense<0.000000e+00> : vector<8xf32>
    %261 = vector.multi_reduction <add>, %260, %cst_110 [1] : vector<8x8xf32> to vector<8xf32>
    %262 = vector.shape_cast %261 : vector<8xf32> to vector<8x1xf32>
    %263 = vector.broadcast %262 : vector<8x1xf32> to vector<8x8xf32>
    %264 = arith.divf %260, %263 : vector<8x8xf32>
    %cst_111 = arith.constant dense<0.000000e+00> : vector<8x16xf32>
    %265 = tpu.matmul %264, %249, %cst_111 {dimension_numbers = #tpu.dot_dimension_numbers<[1], [0], [0], [1], [0, 0, 1, 1], [], []>} : vector<8x8xf32>, vector<8x16xf32>, vector<8x16xf32> -> vector<8x16xf32>
    %266 = vector.extract_strided_slice %246 {offsets = [0, 16], sizes = [8, 16], strides = [1, 1]} : vector<8x96xf32> to vector<8x16xf32>
    %267 = vector.extract_strided_slice %246 {offsets = [0, 48], sizes = [8, 16], strides = [1, 1]} : vector<8x96xf32> to vector<8x16xf32>
    %268 = vector.extract_strided_slice %246 {offsets = [0, 80], sizes = [8, 16], strides = [1, 1]} : vector<8x96xf32> to vector<8x16xf32>
    %269 = tpu.transpose %267, [1, 0] : vector<8x16xf32> -> vector<16x8xf32>
    %cst_112 = arith.constant dense<0.000000e+00> : vector<8x8xf32>
    %270 = tpu.matmul %266, %269, %cst_112 {dimension_numbers = #tpu.dot_dimension_numbers<[1], [0], [0], [1], [0, 0, 1, 1], [], []>} : vector<8x16xf32>, vector<16x8xf32>, vector<8x8xf32> -> vector<8x8xf32>
    %cst_113 = arith.constant 2.500000e-01 : f32
    %271 = vector.broadcast %cst_113 : f32 to vector<8x8xf32>
    %272 = arith.mulf %270, %271 : vector<8x8xf32>
    %273 = vector.broadcast %245 : vector<1x8xf32> to vector<8x8xf32>
    %274 = arith.addf %272, %273 : vector<8x8xf32>
    %cst_114 = arith.constant dense<0xFF800000> : vector<8xf32>
    %275 = vector.multi_reduction <maximumf>, %274, %cst_114 [1] : vector<8x8xf32> to vector<8xf32>
    %276 = vector.shape_cast %275 : vector<8xf32> to vector<8x1xf32>
    %277 = vector.broadcast %276 : vector<8x1xf32> to vector<8x8xf32>
    %278 = arith.subf %274, %277 : vector<8x8xf32>
    %279 = math.exp %278 : vector<8x8xf32>
    %cst_115 = arith.constant dense<0.000000e+00> : vector<8xf32>
    %280 = vector.multi_reduction <add>, %279, %cst_115 [1] : vector<8x8xf32> to vector<8xf32>
    %281 = vector.shape_cast %280 : vector<8xf32> to vector<8x1xf32>
    %282 = vector.broadcast %281 : vector<8x1xf32> to vector<8x8xf32>
    %283 = arith.divf %279, %282 : vector<8x8xf32>
    %cst_116 = arith.constant dense<0.000000e+00> : vector<8x16xf32>
    %284 = tpu.matmul %283, %268, %cst_116 {dimension_numbers = #tpu.dot_dimension_numbers<[1], [0], [0], [1], [0, 0, 1, 1], [], []>} : vector<8x8xf32>, vector<8x16xf32>, vector<8x16xf32> -> vector<8x16xf32>
    %285 = tpu.concatenate %265, %284 in 1 : vector<8x16xf32>, vector<8x16xf32> -> vector<8x32xf32>
    %286 = tpu.concatenate %244, %285 in 0 : vector<8x32xf32>, vector<8x32xf32> -> vector<16x32xf32>
    %c1_117 = arith.constant 1 : index
    %c0_118 = arith.constant 0 : index
    %c0_119 = arith.constant 0 : index
    %287 = vector.load %arg6[%c1_117, %c0_118, %c0_119] : memref<2x32x32xf32, #tpu.memory_space<vmem>>, vector<1x32x32xf32>
    %288 = vector.shape_cast %287 : vector<1x32x32xf32> to vector<32x32xf32>
    %cst_120 = arith.constant dense<0.000000e+00> : vector<16x32xf32>
    %289 = tpu.matmul %286, %288, %cst_120 {dimension_numbers = #tpu.dot_dimension_numbers<[1], [0], [0], [1], [0, 0, 1, 1], [], []>} : vector<16x32xf32>, vector<32x32xf32>, vector<16x32xf32> -> vector<16x32xf32>
    %c1_121 = arith.constant 1 : index
    %c0_122 = arith.constant 0 : index
    %c0_123 = arith.constant 0 : index
    %290 = vector.load %arg7[%c1_121, %c0_122, %c0_123] : memref<2x1x32xf32, #tpu.memory_space<vmem>>, vector<1x1x32xf32>
    %291 = vector.shape_cast %290 : vector<1x1x32xf32> to vector<1x32xf32>
    %292 = vector.broadcast %291 : vector<1x32xf32> to vector<16x32xf32>
    %293 = arith.addf %289, %292 : vector<16x32xf32>
    %294 = arith.addf %293, %196 : vector<16x32xf32>
    %c1_124 = arith.constant 1 : index
    %c0_125 = arith.constant 0 : index
    %c0_126 = arith.constant 0 : index
    %295 = vector.load %arg8[%c1_124, %c0_125, %c0_126] : memref<2x1x32xf32, #tpu.memory_space<vmem>>, vector<1x1x32xf32>
    %296 = vector.shape_cast %295 : vector<1x1x32xf32> to vector<1x32xf32>
    %c1_127 = arith.constant 1 : index
    %c0_128 = arith.constant 0 : index
    %c0_129 = arith.constant 0 : index
    %297 = vector.load %arg9[%c1_127, %c0_128, %c0_129] : memref<2x1x32xf32, #tpu.memory_space<vmem>>, vector<1x1x32xf32>
    %298 = vector.shape_cast %297 : vector<1x1x32xf32> to vector<1x32xf32>
    %cst_130 = arith.constant dense<0.000000e+00> : vector<16xf32>
    %299 = vector.multi_reduction <add>, %294, %cst_130 [1] : vector<16x32xf32> to vector<16xf32>
    %300 = vector.shape_cast %299 : vector<16xf32> to vector<16x1xf32>
    %cst_131 = arith.constant 3.200000e+01 : f32
    %301 = vector.broadcast %cst_131 : f32 to vector<16x1xf32>
    %302 = arith.divf %300, %301 : vector<16x1xf32>
    %303 = vector.broadcast %302 : vector<16x1xf32> to vector<16x32xf32>
    %304 = arith.subf %294, %303 : vector<16x32xf32>
    %305 = arith.mulf %304, %304 : vector<16x32xf32>
    %cst_132 = arith.constant dense<0.000000e+00> : vector<16xf32>
    %306 = vector.multi_reduction <add>, %305, %cst_132 [1] : vector<16x32xf32> to vector<16xf32>
    %307 = vector.shape_cast %306 : vector<16xf32> to vector<16x1xf32>
    %cst_133 = arith.constant 3.200000e+01 : f32
    %308 = vector.broadcast %cst_133 : f32 to vector<16x1xf32>
    %309 = arith.divf %307, %308 : vector<16x1xf32>
    %cst_134 = arith.constant 9.99999996E-13 : f32
    %310 = vector.broadcast %cst_134 : f32 to vector<16x1xf32>
    %311 = arith.addf %309, %310 : vector<16x1xf32>
    %312 = math.rsqrt %311 : vector<16x1xf32>
    %313 = vector.broadcast %312 : vector<16x1xf32> to vector<16x32xf32>
    %314 = arith.mulf %304, %313 : vector<16x32xf32>
    %315 = vector.broadcast %296 : vector<1x32xf32> to vector<16x32xf32>
    %316 = arith.mulf %314, %315 : vector<16x32xf32>
    %317 = vector.broadcast %298 : vector<1x32xf32> to vector<16x32xf32>
    %318 = arith.addf %316, %317 : vector<16x32xf32>
    %c1_135 = arith.constant 1 : index
    %c0_136 = arith.constant 0 : index
    %c0_137 = arith.constant 0 : index
    %319 = vector.load %arg10[%c1_135, %c0_136, %c0_137] : memref<2x32x64xf32, #tpu.memory_space<vmem>>, vector<1x32x64xf32>
    %320 = vector.shape_cast %319 : vector<1x32x64xf32> to vector<32x64xf32>
    %cst_138 = arith.constant dense<0.000000e+00> : vector<16x64xf32>
    %321 = tpu.matmul %318, %320, %cst_138 {dimension_numbers = #tpu.dot_dimension_numbers<[1], [0], [0], [1], [0, 0, 1, 1], [], []>} : vector<16x32xf32>, vector<32x64xf32>, vector<16x64xf32> -> vector<16x64xf32>
    %c1_139 = arith.constant 1 : index
    %c0_140 = arith.constant 0 : index
    %c0_141 = arith.constant 0 : index
    %322 = vector.load %arg11[%c1_139, %c0_140, %c0_141] : memref<2x1x64xf32, #tpu.memory_space<vmem>>, vector<1x1x64xf32>
    %323 = vector.shape_cast %322 : vector<1x1x64xf32> to vector<1x64xf32>
    %324 = vector.broadcast %323 : vector<1x64xf32> to vector<16x64xf32>
    %325 = arith.addf %321, %324 : vector<16x64xf32>
    %cst_142 = arith.constant 5.000000e-01 : f32
    %326 = vector.broadcast %cst_142 : f32 to vector<16x64xf32>
    %327 = arith.mulf %326, %325 : vector<16x64xf32>
    %cst_143 = arith.constant 4.471500e-02 : f32
    %328 = vector.broadcast %cst_143 : f32 to vector<16x64xf32>
    %329 = arith.mulf %328, %325 : vector<16x64xf32>
    %330 = arith.mulf %329, %325 : vector<16x64xf32>
    %331 = arith.mulf %330, %325 : vector<16x64xf32>
    %332 = arith.addf %325, %331 : vector<16x64xf32>
    %cst_144 = arith.constant 0.797884583 : f32
    %333 = vector.broadcast %cst_144 : f32 to vector<16x64xf32>
    %334 = arith.mulf %333, %332 : vector<16x64xf32>
    %335 = math.tanh %334 : vector<16x64xf32>
    %cst_145 = arith.constant 1.000000e+00 : f32
    %336 = vector.broadcast %cst_145 : f32 to vector<16x64xf32>
    %337 = arith.addf %336, %335 : vector<16x64xf32>
    %338 = arith.mulf %327, %337 : vector<16x64xf32>
    %c1_146 = arith.constant 1 : index
    %c0_147 = arith.constant 0 : index
    %c0_148 = arith.constant 0 : index
    %339 = vector.load %arg12[%c1_146, %c0_147, %c0_148] : memref<2x64x32xf32, #tpu.memory_space<vmem>>, vector<1x64x32xf32>
    %340 = vector.shape_cast %339 : vector<1x64x32xf32> to vector<64x32xf32>
    %cst_149 = arith.constant dense<0.000000e+00> : vector<16x32xf32>
    %341 = tpu.matmul %338, %340, %cst_149 {dimension_numbers = #tpu.dot_dimension_numbers<[1], [0], [0], [1], [0, 0, 1, 1], [], []>} : vector<16x64xf32>, vector<64x32xf32>, vector<16x32xf32> -> vector<16x32xf32>
    %c1_150 = arith.constant 1 : index
    %c0_151 = arith.constant 0 : index
    %c0_152 = arith.constant 0 : index
    %342 = vector.load %arg13[%c1_150, %c0_151, %c0_152] : memref<2x1x32xf32, #tpu.memory_space<vmem>>, vector<1x1x32xf32>
    %343 = vector.shape_cast %342 : vector<1x1x32xf32> to vector<1x32xf32>
    %344 = vector.broadcast %343 : vector<1x32xf32> to vector<16x32xf32>
    %345 = arith.addf %341, %344 : vector<16x32xf32>
    %346 = arith.addf %345, %318 : vector<16x32xf32>
    %c1_153 = arith.constant 1 : index
    %c0_154 = arith.constant 0 : index
    %c0_155 = arith.constant 0 : index
    %347 = vector.load %arg14[%c1_153, %c0_154, %c0_155] : memref<2x1x32xf32, #tpu.memory_space<vmem>>, vector<1x1x32xf32>
    %348 = vector.shape_cast %347 : vector<1x1x32xf32> to vector<1x32xf32>
    %c1_156 = arith.constant 1 : index
    %c0_157 = arith.constant 0 : index
    %c0_158 = arith.constant 0 : index
    %349 = vector.load %arg15[%c1_156, %c0_157, %c0_158] : memref<2x1x32xf32, #tpu.memory_space<vmem>>, vector<1x1x32xf32>
    %350 = vector.shape_cast %349 : vector<1x1x32xf32> to vector<1x32xf32>
    %cst_159 = arith.constant dense<0.000000e+00> : vector<16xf32>
    %351 = vector.multi_reduction <add>, %346, %cst_159 [1] : vector<16x32xf32> to vector<16xf32>
    %352 = vector.shape_cast %351 : vector<16xf32> to vector<16x1xf32>
    %cst_160 = arith.constant 3.200000e+01 : f32
    %353 = vector.broadcast %cst_160 : f32 to vector<16x1xf32>
    %354 = arith.divf %352, %353 : vector<16x1xf32>
    %355 = vector.broadcast %354 : vector<16x1xf32> to vector<16x32xf32>
    %356 = arith.subf %346, %355 : vector<16x32xf32>
    %357 = arith.mulf %356, %356 : vector<16x32xf32>
    %cst_161 = arith.constant dense<0.000000e+00> : vector<16xf32>
    %358 = vector.multi_reduction <add>, %357, %cst_161 [1] : vector<16x32xf32> to vector<16xf32>
    %359 = vector.shape_cast %358 : vector<16xf32> to vector<16x1xf32>
    %cst_162 = arith.constant 3.200000e+01 : f32
    %360 = vector.broadcast %cst_162 : f32 to vector<16x1xf32>
    %361 = arith.divf %359, %360 : vector<16x1xf32>
    %cst_163 = arith.constant 9.99999996E-13 : f32
    %362 = vector.broadcast %cst_163 : f32 to vector<16x1xf32>
    %363 = arith.addf %361, %362 : vector<16x1xf32>
    %364 = math.rsqrt %363 : vector<16x1xf32>
    %365 = vector.broadcast %364 : vector<16x1xf32> to vector<16x32xf32>
    %366 = arith.mulf %356, %365 : vector<16x32xf32>
    %367 = vector.broadcast %348 : vector<1x32xf32> to vector<16x32xf32>
    %368 = arith.mulf %366, %367 : vector<16x32xf32>
    %369 = vector.broadcast %350 : vector<1x32xf32> to vector<16x32xf32>
    %370 = arith.addf %368, %369 : vector<16x32xf32>
    %371 = vector.extract_strided_slice %370 {offsets = [0, 0], sizes = [1, 32], strides = [1, 1]} : vector<16x32xf32> to vector<1x32xf32>
    %372 = vector.extract_strided_slice %370 {offsets = [8, 0], sizes = [1, 32], strides = [1, 1]} : vector<16x32xf32> to vector<1x32xf32>
    %373 = tpu.concatenate %371, %372 in 0 : vector<1x32xf32>, vector<1x32xf32> -> vector<2x32xf32>
    %c0_164 = arith.constant 0 : index
    %c0_165 = arith.constant 0 : index
    %374 = vector.load %arg16[%c0_164, %c0_165] : memref<32x32xf32, #tpu.memory_space<vmem>>, vector<32x32xf32>
    %cst_166 = arith.constant dense<0.000000e+00> : vector<2x32xf32>
    %375 = tpu.matmul %373, %374, %cst_166 {dimension_numbers = #tpu.dot_dimension_numbers<[1], [0], [0], [1], [0, 0, 1, 1], [], []>} : vector<2x32xf32>, vector<32x32xf32>, vector<2x32xf32> -> vector<2x32xf32>
    %c0_167 = arith.constant 0 : index
    %c0_168 = arith.constant 0 : index
    %376 = vector.load %arg17[%c0_167, %c0_168] : memref<1x32xf32, #tpu.memory_space<vmem>>, vector<1x32xf32>
    %377 = vector.broadcast %376 : vector<1x32xf32> to vector<2x32xf32>
    %378 = arith.addf %375, %377 : vector<2x32xf32>
    %379 = math.tanh %378 : vector<2x32xf32>
    %c0_169 = arith.constant 0 : index
    %c0_170 = arith.constant 0 : index
    %380 = vector.load %arg18[%c0_169, %c0_170] : memref<32x3xf32, #tpu.memory_space<vmem>>, vector<32x3xf32>
    %cst_171 = arith.constant dense<0.000000e+00> : vector<2x3xf32>
    %381 = tpu.matmul %379, %380, %cst_171 {dimension_numbers = #tpu.dot_dimension_numbers<[1], [0], [0], [1], [0, 0, 1, 1], [], []>} : vector<2x32xf32>, vector<32x3xf32>, vector<2x3xf32> -> vector<2x3xf32>
    %c0_172 = arith.constant 0 : index
    %c0_173 = arith.constant 0 : index
    %382 = vector.load %arg19[%c0_172, %c0_173] : memref<1x3xf32, #tpu.memory_space<vmem>>, vector<1x3xf32>
    %383 = vector.broadcast %382 : vector<1x3xf32> to vector<2x3xf32>
    %384 = arith.addf %381, %383 : vector<2x3xf32>
    %cst_174 = arith.constant dense<0xFF800000> : vector<2xf32>
    %385 = vector.multi_reduction <maximumf>, %384, %cst_174 [1] : vector<2x3xf32> to vector<2xf32>
    %386 = vector.shape_cast %385 : vector<2xf32> to vector<2x1xf32>
    %387 = vector.broadcast %386 : vector<2x1xf32> to vector<2x3xf32>
    %388 = arith.subf %384, %387 : vector<2x3xf32>
    %389 = math.exp %388 : vector<2x3xf32>
    %cst_175 = arith.constant dense<0.000000e+00> : vector<2xf32>
    %390 = vector.multi_reduction <add>, %389, %cst_175 [1] : vector<2x3xf32> to vector<2xf32>
    %391 = vector.shape_cast %390 : vector<2xf32> to vector<2x1xf32>
    %392 = vector.broadcast %391 : vector<2x1xf32> to vector<2x3xf32>
    %393 = arith.divf %389, %392 : vector<2x3xf32>
    %c0_176 = arith.constant 0 : index
    %c0_177 = arith.constant 0 : index
    %394 = vector.load %arg20[%c0_176, %c0_177] : memref<2x3xf32, #tpu.memory_space<vmem>>, vector<2x3xf32>
    tpu.vector_store %arg20[%c0_176, %c0_177], %393 {strides = array<i32>} : memref<2x3xf32, #tpu.memory_space<vmem>>, vector<2x3xf32>,
    return
  }
}

</mosaic_0001>

<bundles_post_ra>
// kernel: tpu_custom_call.1
= control target key start
LH: loop header
LB: loop body
LE: loop exit
PB: predicated region body
PF: predicated region fallthrough
CT: control target
= control target key end

     0   :  { %s2479_s0 = inlined_call_operand.hbm [shape: f32[16,32], index: 0, kind: input, shape index: {}]   ;;  %s2480_s1 = inlined_call_operand.vmem [shape: f32[2,8], index: 1, kind: input, shape index: {}]   ;;  %s2481_s2 = inlined_call_operand.hbm [shape: f32[1,32], index: 2, kind: input, shape index: {}]   ;;  %s2482_s3 = inlined_call_operand.hbm [shape: f32[1,32], index: 3, kind: input, shape index: {}]   ;;  %s2483_s4 = inlined_call_operand.vmem [shape: f32[2,32,96], index: 4, kind: input, shape index: {}]   ;;  %s2484_s5 = inlined_call_operand.vmem [shape: f32[2,1,96], index: 5, kind: input, shape index: {}]   ;;  %s2485_s6 = inlined_call_operand.vmem [shape: f32[2,32,32], index: 6, kind: input, shape index: {}]   ;;  %s2486_s7 = inlined_call_operand.vmem [shape: f32[2,1,32], index: 7, kind: input, shape index: {}]   ;;  %s2487_s8 = inlined_call_operand.hbm [shape: f32[2,1,32], index: 8, kind: input, shape index: {}]   ;;  %s2488_s9 = inlined_call_operand.vmem [shape: f32[2,1,32], index: 9, kind: input, shape index: {}]   ;;  %s2489_s10 = inlined_call_operand.vmem [shape: f32[2,32,64], index: 10, kind: input, shape index: {}]   ;;  %s2490_s11 = inlined_call_operand.hbm [shape: f32[2,1,64], index: 11, kind: input, shape index: {}]   ;;  %s2491_s12 = inlined_call_operand.vmem [shape: f32[2,64,32], index: 12, kind: input, shape index: {}]   ;;  %s2492_s13 = inlined_call_operand.vmem [shape: f32[2,1,32], index: 13, kind: input, shape index: {}]   ;;  %s2493_s14 = inlined_call_operand.hbm [shape: f32[2,1,32], index: 14, kind: input, shape index: {}]   ;;  %s2494_s15 = inlined_call_operand.vmem [shape: f32[2,1,32], index: 15, kind: input, shape index: {}]   ;;  %s2495_s16 = inlined_call_operand.vmem [shape: f32[32,32], index: 16, kind: input, shape index: {}]   ;;  %s2496_s17 = inlined_call_operand.vmem [shape: f32[1,32], index: 17, kind: input, shape index: {}]   ;;  %s2497_s18 = inlined_call_operand.vmem [shape: f32[32,3], index: 18, kind: input, shape index: {}]   ;;  %s2498_s19 = inlined_call_operand.vmem [shape: f32[1,3], index: 19, kind: input, shape index: {}]   ;;  %s2499_s20 = inlined_call_operand.hbm [shape: f32[2,3], index: 20, kind: output, shape index: {}]  }
   0x1   :  { %2502 = sst [smem:[#allocation19_spill]] %s2479_s0 }
   0x2   :  { %2503 = sst [smem:[#allocation20_spill]] %s2480_s1 }
   0x3   :  { %2504 = sst [smem:[#allocation21_spill]] %s2481_s2 }
   0x4   :  { %2505 = sst [smem:[#allocation22_spill]] %s2482_s3 }
   0x5   :  { %2506 = sst [smem:[#allocation23_spill]] %s2483_s4 }
   0x6   :  { %2507 = sst [smem:[#allocation24_spill]] %s2496_s17 }
   0x7   :  { %2508 = sst [smem:[#allocation25_spill]] %s2498_s19 }
   0x8   :  { %2509 = sst [smem:[#allocation26_spill]] %s2499_s20 }
   0x9   :  { %25 = vsyncpa [#allocation3], 0 }
   0xa   :  { %26 = vsyncpa [#allocation6], 0 }
   0xb   :  { %27 = vsyncpa [#allocation9], 0 }
   0xc   :  { %28 = vsyncpa [#allocation12], 0  ;;  %s2510_s23 = sld [smem:[#allocation21_spill]] }
  0x12   :  { %s50_s24 = sshll.u32 %s2510_s23, 4  ;;  %s51_s24 = int_to_ptr.hbm [resolvable:$true] %s50_s24 }
  0x13   :  { %29 = vsyncpa [#allocation4], 0  ;;  %s1935_s2 = smov [#allocation5]   ;;  %s79_s27 = sshll.u32 %s2487_s8, 4  ;;  %s80_s27 = int_to_ptr.hbm [resolvable:$true] %s79_s27 }
  0x14   :  { %s52_s25 = sshll.u32 %s1935_s2, 4  ;;  %s1936_s28 = smov [#allocation8]   ;;  %s53_s25 = int_to_ptr.vmem [resolvable:$true] %s52_s25 }
  0x15   :  { %55 = dma.hbm_to_vmem [thread:$0]  %s51_s24, 16, %s53_s25, [#allocation6]  }
  0x16   :  { %s81_s4 = sshll.u32 %s1936_s28, 4  ;;  %s1937_s29 = smov 16   ;;  %s82_s4 = int_to_ptr.vmem [resolvable:$true] %s81_s4 }
  0x17   :  { %s1938_s30 = smov 1   ;;  %s2511_s1 = sld [smem:[#allocation19_spill]] }
  0x18   :  { %87 = dma.hbm_to_vmem [thread:$0]  %s80_s27, 32, %s82_s4, [#allocation9], %s1937_s29, %s1937_s29, %s1938_s30  }
  0x19   :  { %s1939_s23 = smov [#allocation2]   ;;  %s2512_s25 = sld [smem:[#allocation22_spill]] }
  0x1a   :  { %s36_s2 = sshll.u32 %s1939_s23, 4  ;;  %s1940_s26 = smov 128   ;;  %s37_s2 = int_to_ptr.vmem [resolvable:$true] %s36_s2 }
  0x1b   :  { %s1941_s28 = smov 8   ;;  %s1942_s20 = smov [#allocation7]  }
  0x1c   :  { %s63_s19 = sshll.u32 %s1942_s20, 4  ;;  %s96_s4 = sshll.u32 %s2490_s11, 4  ;;  %s64_s19 = int_to_ptr.vmem [resolvable:$true] %s63_s19  ;;  %s97_s4 = int_to_ptr.hbm [resolvable:$true] %s96_s4 }
  0x1d   :  { %s34_s22 = sshll.u32 %s2511_s1, 4  ;;  %s113_s1 = sshll.u32 %s2493_s14, 4  ;;  %s35_s22 = int_to_ptr.hbm [resolvable:$true] %s34_s22  ;;  %s114_s1 = int_to_ptr.hbm [resolvable:$true] %s113_s1 }
  0x1e   :  { %42 = dma.hbm_to_vmem [thread:$0]  %s35_s22, 256, %s37_s2, [#allocation3], %s1940_s26, %s1940_s26, %s1941_s28  }
  0x1f   :  { %s61_s3 = sshll.u32 %s2512_s25, 4  ;;  %s1943_s23 = smov [#allocation10]   ;;  %s62_s3 = int_to_ptr.hbm [resolvable:$true] %s61_s3 }
  0x20   :  { %66 = dma.hbm_to_vmem [thread:$0]  %s62_s3, 16, %s64_s19, [#allocation6]  }
  0x21   :  { %s98_s8 = sshll.u32 %s1943_s23, 4  ;;  %s1944_s20 = smov [#allocation11]   ;;  %s99_s8 = int_to_ptr.vmem [resolvable:$true] %s98_s8 }
  0x22   :  { %104 = dma.hbm_to_vmem [thread:$0]  %s97_s4, 32, %s99_s8, [#allocation9], %s1937_s29, %s1937_s29, %s1938_s30  }
  0x23   :  { %s115_s22 = sshll.u32 %s1944_s20, 4  ;;  %s116_s22 = int_to_ptr.vmem [resolvable:$true] %s115_s22 }
  0x24   :  { %121 = dma.hbm_to_vmem [thread:$0]  %s114_s1, 32, %s116_s22, [#allocation12], %s1937_s29, %s1937_s29, %s1938_s30  }
  0x25   :  { %1925 = dma.done.wait [#allocation3], 256  }
  0x26   :  { %1926 = vsyncadd [#allocation3], 4294967040 }
  0x27   :  { %1927 = dma.done.wait [#allocation6], 32  }
  0x28   :  { %1928 = vsyncadd [#allocation6], 4294967264 }
  0x29   :  { %1929 = dma.done.wait [#allocation9], 64  }
  0x2a   :  { %1930 = vsyncadd [#allocation9], 4294967232 }
  0x2b   :  { %1931 = dma.done.wait [#allocation12], 32  }
  0x2c   :  { %1932 = vsyncadd [#allocation12], 4294967264  ;;  %vm160_vm0 = vcmask 261120   ;;  %v156_v0 = vld [vmem:[#allocation2] sm:$0xff]  ;;  %v157_v1 = vld [vmem:[#allocation2 + $0x8] sm:$0xff]  ;;  %v1945_v4 = vmov 32.0  }
  0x2d   :  { %v161_v2 = vsel %vm160_vm0, %v156_v0, 0.0  ;;  %v164_v3 = vsel %vm160_vm0, %v157_v1, 0.0  ;;  %1689 = vrcp.f32 %v1945_v4  ;;  %s2513_s17 = sld [smem:[#allocation23_spill]]  ;;  %v1667_v42 = vld [vmem:[#allocation5] ss:$0 sm:$0xff]  ;;  %s1946_s27 = smov 112  }
  0x2e   :  { %162 = vadd.xlane.f32.xlu0 %v161_v2  ;;  %165 = vadd.xlane.f32.xlu1 %v164_v3  ;;  %v1668_v46 = vld [vmem:[#allocation7] ss:$0 sm:$0xff]  ;;  %v1669_v53 = vld [vmem:[%s2484_s5] ss:$0 sm:$0xff]  ;;  %s1947_s4 = smov 96   ;;  %s1948_s0 = smov 80  }
  0x2f   :  { %vm263_vm8 = vcmask 130048   ;;  %s2514_s23 = sld [smem:[#allocation20_spill]]  ;;  %vm291_vm9 = vcmask 64512   ;;  %s1949_s8 = smov 64  }
  0x30   :  { %s1950_s20 = smov 48   ;;  %s2516_s26 = sld [smem:[#allocation25_spill]] }
  0x31   :  { %s2517_s1 = sld [smem:[#allocation26_spill]] }
  0x33   :  { %v1690_v5 = vpop.eup %1689  ;;  %v225_v21 = vld [vmem:[%s2513_s17 + $0x18] sm:$0xff]  ;;  %v224_v22 = vld [vmem:[%s2513_s17 + $0x10] sm:$0xff]  ;;  %v223_v23 = vld [vmem:[%s2513_s17 + $0x8] sm:$0xff] }
  0x34   :  { %v168_v6 = vmul.f32 32.0, %v1690_v5  ;;  %vm172_vm1 = vweird.f32 %v1690_v5  ;;  %248 = vmatpush.msra.mxu0 %v225_v21  ;;  %v222_v24 = vld [vmem:[%s2513_s17] sm:$0xff] }
  0x35   :  { %v2127_v60 = vld [vmem:[%s2514_s23] ss:$0 sm:$0xff] }
  0x36   :  { %v169_v7 = vsub.f32 1.0, %v168_v6  ;;  %249 = vmatpush.msra.mxu0 %v224_v22 }
  0x38   :  { %v170_v8 = vmul.f32 %v1690_v5, %v169_v7  ;;  %250 = vmatpush.msra.mxu0 %v223_v23 }
  0x3a   :  { %v171_v9 = vadd.f32 %v1690_v5, %v170_v8  ;;  %251 = vmatpush.msra.mxu0 %v222_v24 }
  0x3c   :  { %v2086_v10 = vsel %vm172_vm1, %v1690_v5, %v171_v9 }
  0xa1   :  { %v163_v11 = vpop.xlane.xlu0 %162  ;;  %v166_v12 = vpop.xlane.xlu1 %165 }
  0xa2   :  { %v174_v13 = vmul.f32 %v2086_v10, %v163_v11  ;;  %v175_v14 = vmul.f32 %v2086_v10, %v166_v12 }
  0xa4   :  { %v176_v15 = vsub.f32 %v156_v0, %v174_v13  ;;  %v177_v16 = vsub.f32 %v157_v1, %v175_v14 }
  0xa6   :  { %v178_v17 = vmul.f32 %v176_v15, %v176_v15  ;;  %v179_v18 = vmul.f32 %v177_v16, %v177_v16 }
  0xa8   :  { %v180_v19 = vsel %vm160_vm0, %v178_v17, 0.0  ;;  %v183_v20 = vsel %vm160_vm0, %v179_v18, 0.0 }
  0xa9   :  { %181 = vadd.xlane.f32.xlu0 %v180_v19  ;;  %184 = vadd.xlane.f32.xlu1 %v183_v20 }
 0x11c   :  { %v182_v25 = vpop.xlane.xlu0 %181  ;;  %v185_v26 = vpop.xlane.xlu1 %184 }
 0x11d   :  { %v186_v27 = vmul.f32 %v182_v25, %v2086_v10  ;;  %v187_v28 = vmul.f32 %v185_v26, %v2086_v10 }
 0x11f   :  { %v188_v29 = vadd.f32 1e-12, %v186_v27  ;;  %v189_v30 = vadd.f32 1e-12, %v187_v28 }
 0x121   :  { %1691 = vrsqrt.f32 %v188_v29  ;;  %vm206_vm2 = vweird.f32 %v189_v30  ;;  %vm196_vm5 = vweird.f32 %v188_v29 }
 0x122   :  { %1693 = vrsqrt.f32 %v189_v30 }
 0x127   :  { %v1692_v31 = vpop.eup %1691 }
 0x128   :  { %v1694_v32 = vpop.eup %1693  ;;  %v191_v33 = vmul.f32 %v1692_v31, %v188_v29  ;;  %vm197_vm4 = vweird.f32 %v1692_v31 }
 0x129   :  { %v201_v34 = vmul.f32 %v1694_v32, %v189_v30  ;;  %vm207_vm3 = vweird.f32 %v1694_v32  ;;  %vm198_vm7 = vmor %vm196_vm5, %vm197_vm4 }
 0x12a   :  { %v192_v35 = vmul.f32 %v1692_v31, %v191_v33  ;;  %vm208_vm6 = vmor %vm206_vm2, %vm207_vm3 }
 0x12b   :  { %v202_v36 = vmul.f32 %v1694_v32, %v201_v34  ;;  %v2153_v34 = vld [vmem:[%s2514_s23 + $0x1] ss:$0 sm:$0xff] }
 0x12c   :  { %v193_v37 = vmul.f32 0.5, %v192_v35 }
 0x12d   :  { %v203_v38 = vmul.f32 0.5, %v202_v36 }
 0x12e   :  { %v194_v39 = vsub.f32 1.5, %v193_v37 }
 0x12f   :  { %v204_v40 = vsub.f32 1.5, %v203_v38 }
 0x130   :  { %v195_v41 = vmul.f32 %v1692_v31, %v194_v39 }
 0x131   :  { %v205_v43 = vmul.f32 %v1694_v32, %v204_v40 }
 0x132   :  { %v199_v44 = vsel %vm198_vm7, %v1692_v31, %v195_v41 }
 0x133   :  { %v210_v45 = vmul.f32 %v199_v44, %v176_v15  ;;  %v209_v47 = vsel %vm208_vm6, %v1694_v32, %v205_v43 }
 0x134   :  { %v211_v49 = vmul.f32 %v209_v47, %v177_v16 }
 0x135   :  { %v215_v48 = vmul.f32 %v1667_v42, %v210_v45 }
 0x136   :  { %v216_v51 = vmul.f32 %v1667_v42, %v211_v49 }
 0x137   :  { %v2106_v50 = vadd.f32 %v1668_v46, %v215_v48 }
 0x138   :  { %v2110_v52 = vadd.f32 %v1668_v46, %v216_v51 }
 0x139   :  { %1583 = vmatmul.msk.f32.vlgmr.msra.gmra.mxu0 %vm160_vm0, %v2106_v50 }
 0x141   :  { %1584 = vmatmul.msk.f32.gmra.mxu0 %vm160_vm0, %v2110_v52 }
 0x1b6   :  { %v253_v54 = vpop.f32.mrf.mxu0 }
 0x1b7   :  { %v254_v55 = vadd.f32 %v1669_v53, %v253_v54 }
 0x1b9   :  { %342 = vrot.lane.b32.xlu0 %v254_v55, %s1946_s27  ;;  %261 = vrot.lane.b32.xlu2 %v254_v55, %s1947_s4 }
 0x1be   :  { %v256_v59 = vpop.f32.mrf.mxu0 }
 0x1bf   :  { %v2131_v3 = vadd.f32 %v1669_v53, %v256_v59 }
 0x1c1   :  { %344 = vrot.lane.b32.xlu2 %v254_v55, %s1948_s0 }
 0x213   :  { %v262_v56 = vpop.permute.xlu2 %261 }
 0x214   :  { %1585 = vmatpush.xpose.msk.msrb.mxu0 %vm263_vm8, %v262_v56 }
 0x217   :  { %1586 = vmatmul.msk.f32.vlgmr.msrb.gmra.mxu0 %vm263_vm8, %v254_v55 }
 0x21b   :  { %v345_v57 = vpop.permute.xlu2 %344 }
 0x21c   :  { %1588 = vmatpush.xpose.msk.msra.mxu3 %vm263_vm8, %v345_v57 }
 0x22b   :  { %v343_v58 = vpop.permute.xlu0 %342 }
 0x22c   :  { %1589 = vmatmul.msk.f32.vlgmr.msra.gmra.mxu3 %vm263_vm8, %v343_v58 }
 0x294   :  { %v285_v61 = vpop.f32.mrf.mxu0 }
 0x295   :  { %v288_v62 = vmul.f32 0.25, %v285_v61 }
 0x297   :  { %v290_v63 = vadd.f32 %v2127_v60, %v288_v62 }
 0x299   :  { %v292_v0 = vsel %vm291_vm9, %v290_v63, -inf }
 0x29a   :  { %293 = vmax.xlane.f32.xlu1 %v292_v0 }
 0x2af   :  { %v367_v1 = vpop.f32.mrf.mxu3 }
 0x2b0   :  { %v370_v2 = vmul.f32 0.25, %v367_v1 }
 0x2b2   :  { %v371_v4 = vadd.f32 %v2127_v60, %v370_v2  ;;  %v596_v2 = vld [vmem:[%s2485_s6 + $0x18] sm:$0xff] }
 0x2b3   :  { %429 = vrot.lane.b32.xlu1 %v2131_v3, %s1947_s4 }
 0x2b4   :  { %v372_v5 = vsel %vm291_vm9, %v371_v4, -inf }
 0x2b5   :  { %373 = vmax.xlane.f32.xlu2 %v372_v5  ;;  %v593_v5 = vld [vmem:[%s2485_s6] sm:$0xff] }
 0x2cd   :  { %316 = vrot.lane.b32.xlu2 %v254_v55, %s1949_s8 }
 0x2d5   :  { %510 = vrot.lane.b32.xlu2 %v2131_v3, %s1948_s0 }
 0x2dd   :  { %508 = vrot.lane.b32.xlu2 %v2131_v3, %s1946_s27 }
 0x30d   :  { %v294_v6 = vpop.xlane.xlu1 %293 }
 0x30e   :  { %v295_v7 = vsub.f32 %v290_v63, %v294_v6 }
 0x310   :  { %v296_v8 = vmul.f32 1.442695, %v295_v7 }
 0x312   :  { %1695 = vpow2.f32 %v296_v8 }
 0x318   :  { %v1696_v9 = vpop.eup %1695 }
 0x319   :  { %v298_v11 = vsel %vm291_vm9, %v1696_v9, 0.0 }
 0x31a   :  { %299 = vadd.xlane.f32.xlu0 %v298_v11 }
 0x325   :  { %v430_v12 = vpop.permute.xlu1 %429 }
 0x326   :  { %1591 = vmatpush.xpose.msk.msra.mxu1 %vm263_vm8, %v430_v12 }
 0x328   :  { %v374_v13 = vpop.xlane.xlu2 %373 }
 0x329   :  { %v375_v14 = vsub.f32 %v371_v4, %v374_v13  ;;  %1592 = vmatmul.msk.f32.vlgmr.msra.gmra.mxu1 %vm263_vm8, %v2131_v3  ;;  %v595_v4 = vld [vmem:[%s2485_s6 + $0x10] sm:$0xff] }
 0x32b   :  { %v376_v15 = vmul.f32 1.442695, %v375_v14 }
 0x32d   :  { %1697 = vpow2.f32 %v376_v15 }
 0x32e   :  { %396 = vrot.lane.b32.xlu0 %v254_v55, %s1950_s20 }
 0x330   :  { %v317_v16 = vpop.permute.xlu2 %316 }
 0x331   :  { %337 = vmatpush.msra.mxu2 %v317_v16 }
 0x333   :  { %v1698_v17 = vpop.eup %1697 }
 0x334   :  { %v378_v18 = vsel %vm291_vm9, %v1698_v17, 0.0 }
 0x335   :  { %379 = vadd.xlane.f32.xlu1 %v378_v18 }
 0x338   :  { %v511_v32 = vpop.permute.xlu2 %510 }
 0x340   :  { %v509_v51 = vpop.permute.xlu2 %508 }
 0x38d   :  { %v300_v19 = vpop.xlane.xlu0 %299 }
 0x38e   :  { %1699 = vrcp.f32 %v300_v19  ;;  %v312_v23 = vand.u32 2147483648, %v300_v19  ;;  %v310_v25 = vand.u32 2147483647, %v300_v19  ;;  %vm306_vm11 = vweird.f32 %v300_v19 }
 0x390   :  { %v313_v27 = vor.u32 1.1754944e-38, %v312_v23  ;;  %vm311_vm13 = vcmp.eq.f32.partialorder %v310_v25, 8.507059e+37 }
 0x394   :  { %v1700_v20 = vpop.eup %1699 }
 0x395   :  { %v302_v21 = vmul.f32 %v1700_v20, %v300_v19  ;;  %vm307_vm10 = vweird.f32 %v1700_v20 }
 0x396   :  { %vm308_vm12 = vmor %vm306_vm11, %vm307_vm10 }
 0x397   :  { %v303_v22 = vsub.f32 1.0, %v302_v21 }
 0x399   :  { %v304_v24 = vmul.f32 %v1700_v20, %v303_v22 }
 0x39b   :  { %v305_v26 = vadd.f32 %v1700_v20, %v304_v24 }
 0x39d   :  { %v309_v28 = vsel %vm308_vm12, %v1700_v20, %v305_v26 }
 0x39e   :  { %v314_v29 = vsel %vm311_vm13, %v313_v27, %v309_v28  ;;  %v2186_v28 = vld [vmem:[%s2486_s7] ss:$0 sm:$0xff] }
 0x39f   :  { %v315_v30 = vmul.f32 %v1696_v9, %v314_v29 }
 0x3a0   :  { %v397_v31 = vpop.permute.xlu0 %396 }
 0x3a1   :  { %1587 = vmatmul.msk.f32.vlgmr.msra.gmra.mxu2 %vm291_vm9, %v315_v30 }
 0x3a2   :  { %417 = vmatpush.msrb.mxu2 %v397_v31 }
 0x3a4   :  { %1594 = vmatpush.xpose.msk.msra.mxu2 %vm263_vm8, %v511_v32 }
 0x3a6   :  { %v452_v33 = vpop.f32.mrf.mxu1 }
 0x3a7   :  { %v455_v35 = vmul.f32 0.25, %v452_v33 }
 0x3a8   :  { %v380_v36 = vpop.xlane.xlu1 %379 }
 0x3a9   :  { %1701 = vrcp.f32 %v380_v36  ;;  %v457_v37 = vadd.f32 %v2153_v34, %v455_v35  ;;  %v392_v42 = vand.u32 2147483648, %v380_v36  ;;  %v390_v44 = vand.u32 2147483647, %v380_v36 }
 0x3aa   :  { %vm386_vm15 = vweird.f32 %v380_v36 }
 0x3ab   :  { %v458_v38 = vsel %vm291_vm9, %v457_v37, -inf  ;;  %v393_v46 = vor.u32 1.1754944e-38, %v392_v42  ;;  %vm391_vm2 = vcmp.eq.f32.partialorder %v390_v44, 8.507059e+37 }
 0x3ac   :  { %459 = vmax.xlane.f32.xlu1 %v458_v38 }
 0x3af   :  { %v1702_v39 = vpop.eup %1701 }
 0x3b0   :  { %v382_v40 = vmul.f32 %v1702_v39, %v380_v36  ;;  %vm387_vm14 = vweird.f32 %v1702_v39 }
 0x3b1   :  { %vm388_vm1 = vmor %vm386_vm15, %vm387_vm14 }
 0x3b2   :  { %v383_v41 = vsub.f32 1.0, %v382_v40 }
 0x3b4   :  { %v384_v43 = vmul.f32 %v1702_v39, %v383_v41 }
 0x3b6   :  { %v385_v45 = vadd.f32 %v1702_v39, %v384_v43 }
 0x3b8   :  { %v389_v47 = vsel %vm388_vm1, %v1702_v39, %v385_v45  ;;  %vm755_vm1 = vcmask 523264  }
 0x3b9   :  { %v394_v48 = vsel %vm391_vm2, %v393_v46, %v389_v47 }
 0x3ba   :  { %v395_v49 = vmul.f32 %v1698_v17, %v394_v48 }
 0x3bc   :  { %1590 = vmatmul.msk.f32.vlgmr.msrb.gmra.mxu2 %vm291_vm9, %v395_v49 }
 0x3c4   :  { %1595 = vmatmul.msk.f32.vlgmr.msra.gmra.mxu2 %vm263_vm8, %v509_v51 }
 0x3c5   :  { %482 = vrot.lane.b32.xlu1 %v2131_v3, %s1949_s8 }
 0x41f   :  { %v460_v53 = vpop.xlane.xlu1 %459 }
 0x420   :  { %v461_v54 = vsub.f32 %v457_v37, %v460_v53  ;;  %v691_v53 = vld [vmem:[%s2489_s10 + $0x18] sm:$0xff] }
 0x421   :  { %714 = vmatpush.msra.mxu0 %v691_v53 }
 0x422   :  { %v462_v55 = vmul.f32 1.442695, %v461_v54  ;;  %v690_v54 = vld [vmem:[%s2489_s10 + $0x10] sm:$0xff] }
 0x423   :  { %715 = vmatpush.msra.mxu0 %v690_v54 }
 0x424   :  { %1703 = vpow2.f32 %v462_v55  ;;  %v339_v58 = vpop.f32.mrf.mxu2  ;;  %v689_v55 = vld [vmem:[%s2489_s10 + $0x8] sm:$0xff] }
 0x425   :  { %716 = vmatpush.msra.mxu0 %v689_v55 }
 0x42a   :  { %v1704_v56 = vpop.eup %1703 }
 0x42b   :  { %v464_v57 = vsel %vm291_vm9, %v1704_v56, 0.0 }
 0x42c   :  { %465 = vadd.xlane.f32.xlu2 %v464_v57 }
 0x437   :  { %v483_v59 = vpop.permute.xlu1 %482 }
 0x438   :  { %503 = vmatpush.msrb.mxu3 %v483_v59 }
 0x43a   :  { %619 = vmatpush.msra.mxu3 %v596_v2 }
 0x43c   :  { %620 = vmatpush.msra.mxu3 %v595_v4 }
 0x43f   :  { %v419_v61 = vpop.f32.mrf.mxu2 }
 0x440   :  { %423 = vrot.lane.b32.xlu1 %v419_v61, %s1937_s29 }
 0x444   :  { %562 = vrot.lane.b32.xlu2 %v2131_v3, %s1950_s20  ;;  %v594_v3 = vld [vmem:[%s2485_s6 + $0x8] sm:$0xff] }
 0x445   :  { %621 = vmatpush.msra.mxu3 %v594_v3 }
 0x447   :  { %v533_v62 = vpop.f32.mrf.mxu2  ;;  %622 = vmatpush.msra.mxu3 %v593_v5  ;;  %v2210_v5 = vld [vmem:[#allocation8] ss:$0 sm:$0xff] }
 0x448   :  { %v536_v63 = vmul.f32 0.25, %v533_v62 }
 0x44a   :  { %v537_v0 = vadd.f32 %v2153_v34, %v536_v63 }
 0x44c   :  { %v538_v1 = vsel %vm291_vm9, %v537_v0, -inf }
 0x44d   :  { %539 = vmax.xlane.f32.xlu0 %v538_v1 }
 0x49f   :  { %v466_v6 = vpop.xlane.xlu2 %465 }
 0x4a0   :  { %1705 = vrcp.f32 %v466_v6  ;;  %v478_v12 = vand.u32 2147483648, %v466_v6  ;;  %v476_v14 = vand.u32 2147483647, %v466_v6  ;;  %vm472_vm4 = vweird.f32 %v466_v6 }
 0x4a2   :  { %v479_v16 = vor.u32 1.1754944e-38, %v478_v12  ;;  %vm477_vm6 = vcmp.eq.f32.partialorder %v476_v14, 8.507059e+37  ;;  %v750_v12 = vld [vmem:[%s2491_s12 + $0x38] sm:$0xff]  ;;  %v748_v14 = vld [vmem:[%s2491_s12 + $0x28] sm:$0xff] }
 0x4a3   :  { %770 = vmatpush.msrb.mxu2 %v750_v12 }
 0x4a6   :  { %v1706_v7 = vpop.eup %1705 }
 0x4a7   :  { %v468_v8 = vmul.f32 %v1706_v7, %v466_v6  ;;  %v563_v9 = vpop.permute.xlu2 %562  ;;  %vm473_vm3 = vweird.f32 %v1706_v7 }
 0x4a8   :  { %583 = vmatpush.msrb.mxu1 %v563_v9  ;;  %vm474_vm5 = vmor %vm472_vm4, %vm473_vm3 }
 0x4a9   :  { %v469_v11 = vsub.f32 1.0, %v468_v8  ;;  %v2215_v8 = vld [vmem:[%s2488_s9] ss:$0 sm:$0xff] }
 0x4ab   :  { %v470_v13 = vmul.f32 %v1706_v7, %v469_v11 }
 0x4ad   :  { %v471_v15 = vadd.f32 %v1706_v7, %v470_v13  ;;  %v749_v13 = vld [vmem:[%s2491_s12 + $0x30] sm:$0xff] }
 0x4ae   :  { %771 = vmatpush.msrb.mxu2 %v749_v13 }
 0x4af   :  { %v475_v17 = vsel %vm474_vm5, %v1706_v7, %v471_v15  ;;  %v747_v15 = vld [vmem:[%s2491_s12 + $0x20] sm:$0xff] }
 0x4b0   :  { %v480_v18 = vsel %vm477_vm6, %v479_v16, %v475_v17  ;;  %772 = vmatpush.msrb.mxu2 %v748_v14  ;;  %v746_v16 = vld [vmem:[%s2491_s12 + $0x18] sm:$0xff]  ;;  %v745_v17 = vld [vmem:[%s2491_s12 + $0x10] sm:$0xff] }
 0x4b1   :  { %v481_v19 = vmul.f32 %v1704_v56, %v480_v18  ;;  %v688_v56 = vld [vmem:[%s2489_s10] sm:$0xff]  ;;  %v744_v18 = vld [vmem:[%s2491_s12 + $0x8] sm:$0xff] }
 0x4b2   :  { %v424_v20 = vpop.permute.xlu1 %423  ;;  %717 = vmatpush.msra.mxu0 %v688_v56  ;;  %773 = vmatpush.msrb.mxu2 %v747_v15 }
 0x4b3   :  { %1593 = vmatmul.msk.f32.vlgmr.msrb.gmra.mxu3 %vm291_vm9, %v481_v19  ;;  %v426_v21 = vsel %vm263_vm8, %v339_v58, %v424_v20  ;;  %v743_v19 = vld [vmem:[%s2491_s12] sm:$0xff] }
 0x4b4   :  { %774 = vmatpush.msrb.mxu2 %v746_v16 }
 0x4b6   :  { %775 = vmatpush.msrb.mxu2 %v745_v17 }
 0x4b8   :  { %776 = vmatpush.msrb.mxu2 %v744_v18 }
 0x4ba   :  { %777 = vmatpush.msrb.mxu2 %v743_v19 }
 0x4bb   :  { %1597 = vmatmul.msk.f32.vlgmr.msra.gmra.mxu3 %vm160_vm0, %v426_v21 }
 0x4c0   :  { %v540_v22 = vpop.xlane.xlu0 %539 }
 0x4c1   :  { %v541_v23 = vsub.f32 %v537_v0, %v540_v22  ;;  %v1675_v22 = vld [vmem:[#allocation10] ss:$0 sm:$0xff] }
 0x4c3   :  { %v542_v24 = vmul.f32 1.442695, %v541_v23 }
 0x4c5   :  { %1707 = vpow2.f32 %v542_v24 }
 0x4cb   :  { %v1708_v25 = vpop.eup %1707 }
 0x4cc   :  { %v544_v26 = vsel %vm291_vm9, %v1708_v25, 0.0 }
 0x4cd   :  { %545 = vadd.xlane.f32.xlu1 %v544_v26 }
 0x536   :  { %v505_v27 = vpop.f32.mrf.mxu3 }
 0x53e   :  { %v624_v29 = vpop.f32.mrf.mxu3 }
 0x53f   :  { %v625_v30 = vadd.f32 %v2186_v28, %v624_v29 }
 0x540   :  { %v546_v31 = vpop.xlane.xlu1 %545 }
 0x541   :  { %1709 = vrcp.f32 %v546_v31  ;;  %v630_v32 = vadd.f32 %v625_v30, %v2106_v50  ;;  %v558_v38 = vand.u32 2147483648, %v546_v31  ;;  %v556_v40 = vand.u32 2147483647, %v546_v31 }
 0x542   :  { %vm552_vm10 = vweird.f32 %v546_v31 }
 0x543   :  { %v634_v33 = vsel %vm160_vm0, %v630_v32, 0.0  ;;  %v559_v42 = vor.u32 1.1754944e-38, %v558_v38  ;;  %vm557_vm12 = vcmp.eq.f32.partialorder %v556_v40, 8.507059e+37 }
 0x544   :  { %635 = vadd.xlane.f32.xlu0 %v634_v33 }
 0x547   :  { %v1710_v35 = vpop.eup %1709 }
 0x548   :  { %v548_v36 = vmul.f32 %v1710_v35, %v546_v31  ;;  %vm553_vm7 = vweird.f32 %v1710_v35 }
 0x549   :  { %vm554_vm11 = vmor %vm552_vm10, %vm553_vm7 }
 0x54a   :  { %v549_v37 = vsub.f32 1.0, %v548_v36 }
 0x54c   :  { %v550_v39 = vmul.f32 %v1710_v35, %v549_v37 }
 0x54e   :  { %v551_v41 = vadd.f32 %v1710_v35, %v550_v39 }
 0x550   :  { %v555_v43 = vsel %vm554_vm11, %v1710_v35, %v551_v41  ;;  %v2253_v41 = vld [vmem:[%s2492_s13] ss:$0 sm:$0xff] }
 0x551   :  { %v560_v44 = vsel %vm557_vm12, %v559_v42, %v555_v43 }
 0x552   :  { %v561_v45 = vmul.f32 %v1708_v25, %v560_v44 }
 0x554   :  { %1596 = vmatmul.msk.f32.vlgmr.msrb.gmra.mxu1 %vm291_vm9, %v561_v45 }
 0x5b7   :  { %v636_v50 = vpop.xlane.xlu0 %635 }
 0x5b8   :  { %v640_v46 = vmul.f32 %v636_v50, %v2086_v10 }
 0x5ba   :  { %v642_v47 = vsub.f32 %v630_v32, %v640_v46 }
 0x5bc   :  { %v644_v48 = vmul.f32 %v642_v47, %v642_v47 }
 0x5be   :  { %v646_v49 = vsel %vm160_vm0, %v644_v48, 0.0 }
 0x5bf   :  { %647 = vadd.xlane.f32.xlu2 %v646_v49 }
 0x5d1   :  { %v585_v51 = vpop.f32.mrf.mxu1 }
 0x5d2   :  { %589 = vrot.lane.b32.xlu0 %v585_v51, %s1937_s29 }
 0x632   :  { %v648_v57 = vpop.xlane.xlu2 %647 }
 0x633   :  { %v652_v58 = vmul.f32 %v648_v57, %v2086_v10 }
 0x635   :  { %v654_v59 = vadd.f32 1e-12, %v652_v58 }
 0x637   :  { %1711 = vrsqrt.f32 %v654_v59  ;;  %vm662_vm14 = vweird.f32 %v654_v59 }
 0x63d   :  { %v1712_v61 = vpop.eup %1711 }
 0x63e   :  { %v657_v62 = vmul.f32 %v1712_v61, %v654_v59  ;;  %vm663_vm13 = vweird.f32 %v1712_v61 }
 0x63f   :  { %vm664_vm15 = vmor %vm662_vm14, %vm663_vm13 }
 0x640   :  { %v658_v63 = vmul.f32 %v1712_v61, %v657_v62 }
 0x642   :  { %v659_v0 = vmul.f32 0.5, %v658_v63 }
 0x644   :  { %v590_v1 = vpop.permute.xlu0 %589  ;;  %v660_v2 = vsub.f32 1.5, %v659_v0 }
 0x645   :  { %v592_v4 = vsel %vm263_vm8, %v505_v27, %v590_v1 }
 0x646   :  { %1598 = vmatmul.msk.f32.gmra.mxu3 %vm160_vm0, %v592_v4  ;;  %v661_v3 = vmul.f32 %v1712_v61, %v660_v2  ;;  %v1606_v2 = vld [vmem:[%s2513_s17 + $0x38] sm:$0xff]  ;;  %v1605_v4 = vld [vmem:[%s2513_s17 + $0x30] sm:$0xff] }
 0x647   :  { %871 = vmatpush.msra.mxu1 %v1606_v2 }
 0x648   :  { %v665_v6 = vsel %vm664_vm15, %v1712_v61, %v661_v3  ;;  %v1604_v3 = vld [vmem:[%s2513_s17 + $0x28] sm:$0xff] }
 0x649   :  { %v676_v7 = vmul.f32 %v665_v6, %v642_v47  ;;  %872 = vmatpush.msra.mxu1 %v1605_v4 }
 0x64b   :  { %v681_v9 = vmul.f32 %v2210_v5, %v676_v7  ;;  %873 = vmatpush.msra.mxu1 %v1604_v3 }
 0x64d   :  { %v686_v11 = vadd.f32 %v2215_v8, %v681_v9 }
 0x64f   :  { %1599 = vmatmul.msk.f32.vlgmr.msra.gmra.mxu0 %vm160_vm0, %v686_v11 }
 0x6c9   :  { %v627_v20 = vpop.f32.mrf.mxu3 }
 0x6ca   :  { %v628_v21 = vadd.f32 %v2186_v28, %v627_v20 }
 0x6cc   :  { %v631_v23 = vadd.f32 %v628_v21, %v2110_v52  ;;  %v719_v24 = vpop.f32.mrf.mxu0 }
 0x6cd   :  { %v720_v25 = vadd.f32 %v1675_v22, %v719_v24 }
 0x6ce   :  { %v637_v26 = vsel %vm160_vm0, %v631_v23, 0.0 }
 0x6cf   :  { %638 = vadd.xlane.f32.xlu0 %v637_v26  ;;  %v727_v27 = vmul.f32 0.044715, %v720_v25  ;;  %v725_v35 = vmul.f32 0.5, %v720_v25 }
 0x6d1   :  { %v729_v29 = vmul.f32 %v727_v27, %v720_v25  ;;  %v1677_v27 = vld [vmem:[#allocation11] ss:$0 sm:$0xff] }
 0x6d3   :  { %v731_v30 = vmul.f32 %v729_v29, %v720_v25 }
 0x6d5   :  { %v733_v31 = vadd.f32 %v731_v30, %v720_v25 }
 0x6d7   :  { %v735_v32 = vmul.f32 0.7978846, %v733_v31  ;;  %v1678_v31 = vld [vmem:[%s2494_s15] ss:$0 sm:$0xff] }
 0x6d9   :  { %1713 = vtanh.f32 %v735_v32 }
 0x6df   :  { %v1714_v33 = vpop.eup %1713 }
 0x6e0   :  { %v739_v36 = vadd.f32 1.0, %v1714_v33 }
 0x6e2   :  { %v741_v37 = vmul.f32 %v739_v36, %v725_v35 }
 0x6e4   :  { %1601 = vmatmul.msk.f32.vlgmr.msrb.gmra.mxu2 %vm755_vm1, %v741_v37  ;;  %v1679_v37 = vld [vmem:[%s2484_s5 + $0x1] ss:$0 sm:$0xff] }
 0x742   :  { %v639_v28 = vpop.xlane.xlu0 %638 }
 0x743   :  { %v641_v52 = vmul.f32 %v639_v28, %v2086_v10 }
 0x745   :  { %v643_v38 = vsub.f32 %v631_v23, %v641_v52 }
 0x747   :  { %v645_v39 = vmul.f32 %v643_v38, %v643_v38 }
 0x749   :  { %v649_v40 = vsel %vm160_vm0, %v645_v39, 0.0 }
 0x74a   :  { %650 = vadd.xlane.f32.xlu1 %v649_v40 }
 0x767   :  { %v779_v42 = vpop.f32.mrf.mxu2 }
 0x768   :  { %v780_v43 = vadd.f32 %v2253_v41, %v779_v42 }
 0x76a   :  { %v785_v44 = vadd.f32 %v780_v43, %v686_v11 }
 0x76c   :  { %v789_v45 = vsel %vm160_vm0, %v785_v44, 0.0 }
 0x76d   :  { %790 = vadd.xlane.f32.xlu1 %v789_v45 }
 0x7bd   :  { %v651_v50 = vpop.xlane.xlu1 %650 }
 0x7be   :  { %v653_v46 = vmul.f32 %v651_v50, %v2086_v10 }
 0x7c0   :  { %v655_v47 = vadd.f32 1e-12, %v653_v46 }
 0x7c2   :  { %1715 = vrsqrt.f32 %v655_v47  ;;  %vm672_vm3 = vweird.f32 %v655_v47 }
 0x7c8   :  { %v1716_v48 = vpop.eup %1715 }
 0x7c9   :  { %v667_v49 = vmul.f32 %v1716_v48, %v655_v47  ;;  %vm673_vm2 = vweird.f32 %v1716_v48 }
 0x7ca   :  { %vm674_vm4 = vmor %vm672_vm3, %vm673_vm2 }
 0x7cb   :  { %v668_v51 = vmul.f32 %v1716_v48, %v667_v49 }
 0x7cd   :  { %v669_v53 = vmul.f32 0.5, %v668_v51 }
 0x7cf   :  { %v670_v54 = vsub.f32 1.5, %v669_v53 }
 0x7d1   :  { %v671_v55 = vmul.f32 %v1716_v48, %v670_v54 }
 0x7d3   :  { %v675_v56 = vsel %vm674_vm4, %v1716_v48, %v671_v55 }
 0x7d4   :  { %v677_v57 = vmul.f32 %v675_v56, %v643_v38 }
 0x7d6   :  { %v682_v58 = vmul.f32 %v2210_v5, %v677_v57  ;;  %v1603_v5 = vld [vmem:[%s2513_s17 + $0x20] sm:$0xff] }
 0x7d7   :  { %874 = vmatpush.msra.mxu1 %v1603_v5 }
 0x7d8   :  { %v687_v59 = vadd.f32 %v2215_v8, %v682_v58 }
 0x7da   :  { %1600 = vmatmul.msk.f32.gmra.mxu0 %vm160_vm0, %v687_v59 }
 0x7e0   :  { %v791_v61 = vpop.xlane.xlu1 %790 }
 0x7e1   :  { %v795_v62 = vmul.f32 %v791_v61, %v2086_v10 }
 0x7e3   :  { %v797_v63 = vsub.f32 %v785_v44, %v795_v62 }
 0x7e5   :  { %v799_v0 = vmul.f32 %v797_v63, %v797_v63 }
 0x7e7   :  { %v801_v1 = vsel %vm160_vm0, %v799_v0, 0.0 }
 0x7e8   :  { %802 = vadd.xlane.f32.xlu1 %v801_v1 }
 0x857   :  { %v722_v6 = vpop.f32.mrf.mxu0 }
 0x858   :  { %v723_v7 = vadd.f32 %v1675_v22, %v722_v6 }
 0x85a   :  { %v728_v8 = vmul.f32 0.044715, %v723_v7  ;;  %v726_v21 = vmul.f32 0.5, %v723_v7 }
 0x85b   :  { %v803_v9 = vpop.xlane.xlu1 %802 }
 0x85c   :  { %v730_v11 = vmul.f32 %v728_v8, %v723_v7  ;;  %v807_v12 = vmul.f32 %v803_v9, %v2086_v10 }
 0x85e   :  { %v732_v13 = vmul.f32 %v730_v11, %v723_v7  ;;  %v809_v14 = vadd.f32 1e-12, %v807_v12 }
 0x860   :  { %v734_v15 = vadd.f32 %v732_v13, %v723_v7  ;;  %1717 = vrsqrt.f32 %v809_v14  ;;  %vm817_vm6 = vweird.f32 %v809_v14 }
 0x862   :  { %v736_v16 = vmul.f32 0.7978846, %v734_v15 }
 0x864   :  { %1719 = vtanh.f32 %v736_v16 }
 0x866   :  { %v1718_v17 = vpop.eup %1717 }
 0x867   :  { %v812_v18 = vmul.f32 %v1718_v17, %v809_v14  ;;  %vm818_vm5 = vweird.f32 %v1718_v17 }
 0x868   :  { %vm819_vm7 = vmor %vm817_vm6, %vm818_vm5 }
 0x869   :  { %v813_v20 = vmul.f32 %v1718_v17, %v812_v18 }
 0x86a   :  { %v1720_v19 = vpop.eup %1719 }
 0x86b   :  { %v740_v23 = vadd.f32 1.0, %v1720_v19  ;;  %v814_v24 = vmul.f32 0.5, %v813_v20 }
 0x86d   :  { %v742_v22 = vmul.f32 %v740_v23, %v726_v21  ;;  %v815_v25 = vsub.f32 1.5, %v814_v24 }
 0x86f   :  { %1602 = vmatmul.msk.f32.gmra.mxu2 %vm755_vm1, %v742_v22  ;;  %v816_v26 = vmul.f32 %v1718_v17, %v815_v25 }
 0x871   :  { %v820_v29 = vsel %vm819_vm7, %v1718_v17, %v816_v26 }
 0x872   :  { %v831_v30 = vmul.f32 %v820_v29, %v797_v63 }
 0x874   :  { %v836_v32 = vmul.f32 %v1677_v27, %v831_v30 }
 0x876   :  { %v2280_v33 = vadd.f32 %v1678_v31, %v836_v32 }
 0x878   :  { %1608 = vmatmul.msk.f32.vlgmr.msra.gmra.mxu1 %vm160_vm0, %v2280_v33 }
 0x8f2   :  { %v782_v35 = vpop.f32.mrf.mxu2 }
 0x8f3   :  { %v783_v36 = vadd.f32 %v2253_v41, %v782_v35 }
 0x8f5   :  { %v786_v28 = vadd.f32 %v783_v36, %v687_v59  ;;  %v876_v52 = vpop.f32.mrf.mxu1 }
 0x8f6   :  { %v2288_v38 = vadd.f32 %v1679_v37, %v876_v52 }
 0x8f7   :  { %v792_v39 = vsel %vm160_vm0, %v786_v28, 0.0 }
 0x8f8   :  { %793 = vadd.xlane.f32.xlu1 %v792_v39  ;;  %883 = vrot.lane.b32.xlu2 %v2288_v38, %s1947_s4 }
 0x952   :  { %v884_v40 = vpop.permute.xlu2 %883 }
 0x953   :  { %1610 = vmatpush.xpose.msk.msrb.mxu3 %vm263_vm8, %v884_v40 }
 0x956   :  { %1611 = vmatmul.msk.f32.vlgmr.msrb.gmra.mxu3 %vm263_vm8, %v2288_v38 }
 0x96b   :  { %v794_v41 = vpop.xlane.xlu1 %793 }
 0x96c   :  { %v796_v42 = vmul.f32 %v794_v41, %v2086_v10 }
 0x96e   :  { %v798_v43 = vsub.f32 %v786_v28, %v796_v42 }
 0x970   :  { %v800_v44 = vmul.f32 %v798_v43, %v798_v43 }
 0x972   :  { %v804_v45 = vsel %vm160_vm0, %v800_v44, 0.0 }
 0x973   :  { %805 = vadd.xlane.f32.xlu1 %v804_v45 }
 0x98c   :  { %963 = vrot.lane.b32.xlu1 %v2288_v38, %s1948_s0 }
 0x994   :  { %935 = vrot.lane.b32.xlu1 %v2288_v38, %s1949_s8 }
 0x9d9   :  { %v906_v50 = vpop.f32.mrf.mxu3 }
 0x9da   :  { %v909_v46 = vmul.f32 0.25, %v906_v50 }
 0x9dc   :  { %v910_v47 = vadd.f32 %v2127_v60, %v909_v46 }
 0x9de   :  { %v911_v48 = vsel %vm291_vm9, %v910_v47, -inf }
 0x9df   :  { %912 = vmax.xlane.f32.xlu0 %v911_v48 }
 0x9e6   :  { %v806_v49 = vpop.xlane.xlu1 %805 }
 0x9e7   :  { %v808_v51 = vmul.f32 %v806_v49, %v2086_v10 }
 0x9e9   :  { %v810_v53 = vadd.f32 1e-12, %v808_v51 }
 0x9eb   :  { %1721 = vrsqrt.f32 %v810_v53  ;;  %vm827_vm11 = vweird.f32 %v810_v53 }
 0x9f1   :  { %v1722_v54 = vpop.eup %1721 }
 0x9f2   :  { %v822_v55 = vmul.f32 %v1722_v54, %v810_v53  ;;  %vm828_vm10 = vweird.f32 %v1722_v54 }
 0x9f3   :  { %961 = vrot.lane.b32.xlu0 %v2288_v38, %s1946_s27  ;;  %vm829_vm12 = vmor %vm827_vm11, %vm828_vm10 }
 0x9f4   :  { %v823_v56 = vmul.f32 %v1722_v54, %v822_v55 }
 0x9f6   :  { %v824_v57 = vmul.f32 0.5, %v823_v56 }
 0x9f8   :  { %v825_v58 = vsub.f32 1.5, %v824_v57 }
 0x9fa   :  { %v826_v59 = vmul.f32 %v1722_v54, %v825_v58 }
 0x9fc   :  { %v830_v61 = vsel %vm829_vm12, %v1722_v54, %v826_v59 }
 0x9fd   :  { %v832_v62 = vmul.f32 %v830_v61, %v798_v43 }
 0x9fe   :  { %v964_v63 = vpop.permute.xlu1 %963 }
 0x9ff   :  { %1613 = vmatpush.xpose.msk.msrb.mxu1 %vm263_vm8, %v964_v63  ;;  %v837_v0 = vmul.f32 %v1677_v27, %v832_v62 }
 0xa01   :  { %v2308_v1 = vadd.f32 %v1678_v31, %v837_v0 }
 0xa03   :  { %1609 = vmatmul.msk.f32.gmra.mxu1 %vm160_vm0, %v2308_v1 }
 0xa06   :  { %v936_v2 = vpop.permute.xlu1 %935 }
 0xa07   :  { %956 = vmatpush.msrb.mxu0 %v936_v2 }
 0xa52   :  { %v913_v4 = vpop.xlane.xlu0 %912 }
 0xa53   :  { %v914_v3 = vsub.f32 %v910_v47, %v913_v4 }
 0xa55   :  { %v915_v5 = vmul.f32 1.442695, %v914_v3 }
 0xa57   :  { %1723 = vpow2.f32 %v915_v5 }
 0xa5d   :  { %v1724_v6 = vpop.eup %1723 }
 0xa5e   :  { %v917_v7 = vsel %vm291_vm9, %v1724_v6, 0.0 }
 0xa5f   :  { %918 = vadd.xlane.f32.xlu0 %v917_v7 }
 0xa65   :  { %v962_v8 = vpop.permute.xlu0 %961 }
 0xa66   :  { %1614 = vmatmul.msk.f32.vlgmr.msrb.gmra.mxu1 %vm263_vm8, %v962_v8  ;;  %v1625_v8 = vld [vmem:[%s2485_s6 + $0x38] sm:$0xff] }
 0xa80   :  { %v879_v9 = vpop.f32.mrf.mxu1 }
 0xa81   :  { %v2314_v11 = vadd.f32 %v1679_v37, %v879_v9  ;;  %v1624_v9 = vld [vmem:[%s2485_s6 + $0x30] sm:$0xff] }
 0xa83   :  { %1127 = vrot.lane.b32.xlu2 %v2314_v11, %s1948_s0 }
 0xa8b   :  { %1125 = vrot.lane.b32.xlu2 %v2314_v11, %s1946_s27 }
 0xa93   :  { %1047 = vrot.lane.b32.xlu2 %v2314_v11, %s1947_s4  ;;  %s2515_s4 = sld [smem:[#allocation24_spill]] }
 0xad2   :  { %v919_v12 = vpop.xlane.xlu0 %918 }
 0xad3   :  { %1725 = vrcp.f32 %v919_v12  ;;  %v931_v17 = vand.u32 2147483648, %v919_v12  ;;  %v929_v19 = vand.u32 2147483647, %v919_v12  ;;  %vm925_vm14 = vweird.f32 %v919_v12 }
 0xad5   :  { %v932_v21 = vor.u32 1.1754944e-38, %v931_v17  ;;  %vm930_vm2 = vcmp.eq.f32.partialorder %v929_v19, 8.507059e+37 }
 0xad9   :  { %v1726_v13 = vpop.eup %1725 }
 0xada   :  { %v921_v14 = vmul.f32 %v1726_v13, %v919_v12  ;;  %vm926_vm13 = vweird.f32 %v1726_v13 }
 0xadb   :  { %vm927_vm15 = vmor %vm925_vm14, %vm926_vm13 }
 0xadc   :  { %v922_v15 = vsub.f32 1.0, %v921_v14 }
 0xadd   :  { %v1128_v16 = vpop.permute.xlu2 %1127 }
 0xade   :  { %1619 = vmatpush.xpose.msk.msra.mxu1 %vm263_vm8, %v1128_v16  ;;  %v923_v18 = vmul.f32 %v1726_v13, %v922_v15 }
 0xae0   :  { %v924_v20 = vadd.f32 %v1726_v13, %v923_v18 }
 0xae2   :  { %v928_v23 = vsel %vm927_vm15, %v1726_v13, %v924_v20  ;;  %v1623_v13 = vld [vmem:[%s2485_s6 + $0x28] sm:$0xff] }
 0xae3   :  { %v933_v24 = vsel %vm930_vm2, %v932_v21, %v928_v23  ;;  %v986_v22 = vpop.f32.mrf.mxu1 }
 0xae4   :  { %v989_v25 = vmul.f32 0.25, %v986_v22  ;;  %v934_v27 = vmul.f32 %v1724_v6, %v933_v24 }
 0xae5   :  { %v1126_v26 = vpop.permute.xlu2 %1125 }
 0xae6   :  { %1620 = vmatmul.msk.f32.vlgmr.msra.gmra.mxu1 %vm263_vm8, %v1126_v26  ;;  %1612 = vmatmul.msk.f32.vlgmr.msrb.gmra.mxu0 %vm291_vm9, %v934_v27  ;;  %v990_v29 = vadd.f32 %v2127_v60, %v989_v25 }
 0xae8   :  { %v991_v30 = vsel %vm291_vm9, %v990_v29, -inf }
 0xae9   :  { %992 = vmax.xlane.f32.xlu1 %v991_v30 }
 0xaed   :  { %v1048_v31 = vpop.permute.xlu2 %1047 }
 0xaee   :  { %1616 = vmatpush.xpose.msk.msra.mxu0 %vm263_vm8, %v1048_v31 }
 0xaf1   :  { %1617 = vmatmul.msk.f32.vlgmr.msra.gmra.mxu0 %vm263_vm8, %v2314_v11 }
 0xaf2   :  { %1238 = vmatpush.msrb.mxu0 %v1625_v8 }
 0xaf4   :  { %1239 = vmatpush.msrb.mxu0 %v1624_v9 }
 0xaf6   :  { %1240 = vmatpush.msrb.mxu0 %v1623_v13 }
 0xb5c   :  { %v993_v32 = vpop.xlane.xlu1 %992 }
 0xb5d   :  { %v994_v35 = vsub.f32 %v990_v29, %v993_v32 }
 0xb5f   :  { %v995_v36 = vmul.f32 1.442695, %v994_v35 }
 0xb61   :  { %1727 = vpow2.f32 %v995_v36 }
 0xb63   :  { %v1150_v37 = vpop.f32.mrf.mxu1  ;;  %v2330_v52 = vpop.f32.mrf.mxu0 }
 0xb64   :  { %v1153_v28 = vmul.f32 0.25, %v1150_v37 }
 0xb66   :  { %v1154_v39 = vadd.f32 %v2153_v34, %v1153_v28 }
 0xb67   :  { %v1728_v60 = vpop.eup %1727 }
 0xb68   :  { %v1155_v40 = vsel %vm291_vm9, %v1154_v39, -inf  ;;  %v997_v41 = vsel %vm291_vm9, %v1728_v60, 0.0 }
 0xb69   :  { %1156 = vmax.xlane.f32.xlu2 %v1155_v40  ;;  %998 = vadd.xlane.f32.xlu0 %v997_v41 }
 0xb6e   :  { %v1070_v42 = vpop.f32.mrf.mxu0 }
 0xb6f   :  { %v1073_v43 = vmul.f32 0.25, %v1070_v42 }
 0xb71   :  { %v1074_v44 = vadd.f32 %v2153_v34, %v1073_v43 }
 0xb73   :  { %v1075_v45 = vsel %vm291_vm9, %v1074_v44, -inf }
 0xb74   :  { %1076 = vmax.xlane.f32.xlu0 %v1075_v45 }
 0xb81   :  { %1015 = vrot.lane.b32.xlu2 %v2288_v38, %s1950_s20 }
 0xb88   :  { %1179 = vrot.lane.b32.xlu0 %v2314_v11, %s1950_s20 }
 0xbdc   :  { %v1157_v50 = vpop.xlane.xlu2 %1156  ;;  %v999_v47 = vpop.xlane.xlu0 %998 }
 0xbdd   :  { %v1158_v46 = vsub.f32 %v1154_v39, %v1157_v50  ;;  %1729 = vrcp.f32 %v999_v47  ;;  %v1011_v56 = vand.u32 2147483648, %v999_v47  ;;  %v1009_v59 = vand.u32 2147483647, %v999_v47  ;;  %v1680_v50 = vld [vmem:[%s2486_s7 + $0x1] ss:$0 sm:$0xff] }
 0xbde   :  { %vm1005_vm4 = vweird.f32 %v999_v47 }
 0xbdf   :  { %v1159_v48 = vmul.f32 1.442695, %v1158_v46  ;;  %v1012_v63 = vor.u32 1.1754944e-38, %v1011_v56  ;;  %vm1010_vm6 = vcmp.eq.f32.partialorder %v1009_v59, 8.507059e+37 }
 0xbe1   :  { %1731 = vpow2.f32 %v1159_v48 }
 0xbe3   :  { %v1730_v49 = vpop.eup %1729 }
 0xbe4   :  { %v1016_v51 = vpop.permute.xlu2 %1015  ;;  %v1001_v53 = vmul.f32 %v1730_v49, %v999_v47  ;;  %vm1006_vm3 = vweird.f32 %v1730_v49 }
 0xbe5   :  { %1036 = vmatpush.msra.mxu3 %v1016_v51  ;;  %vm1007_vm5 = vmor %vm1005_vm4, %vm1006_vm3 }
 0xbe6   :  { %v1002_v54 = vsub.f32 1.0, %v1001_v53 }
 0xbe7   :  { %v1732_v34 = vpop.eup %1731  ;;  %v1077_v55 = vpop.xlane.xlu0 %1076 }
 0xbe8   :  { %v1078_v57 = vsub.f32 %v1074_v44, %v1077_v55  ;;  %v1161_v38 = vsel %vm291_vm9, %v1732_v34, 0.0  ;;  %v1003_v58 = vmul.f32 %v1730_v49, %v1002_v54 }
 0xbe9   :  { %1162 = vadd.xlane.f32.xlu1 %v1161_v38 }
 0xbea   :  { %v1079_v61 = vmul.f32 1.442695, %v1078_v57  ;;  %v1004_v62 = vadd.f32 %v1730_v49, %v1003_v58 }
 0xbec   :  { %1733 = vpow2.f32 %v1079_v61  ;;  %v1008_v0 = vsel %vm1007_vm5, %v1730_v49, %v1004_v62 }
 0xbed   :  { %v1013_v2 = vsel %vm1010_vm6, %v1012_v63, %v1008_v0  ;;  %v1632_v63 = vld [vmem:[%s2489_s10 + $0x30] sm:$0xff]  ;;  %v1631_v0 = vld [vmem:[%s2489_s10 + $0x28] sm:$0xff] }
 0xbee   :  { %v1014_v4 = vmul.f32 %v1728_v60, %v1013_v2  ;;  %v1622_v60 = vld [vmem:[%s2485_s6 + $0x20] sm:$0xff] }
 0xbef   :  { %1241 = vmatpush.msrb.mxu0 %v1622_v60  ;;  %v1630_v2 = vld [vmem:[%s2489_s10 + $0x20] sm:$0xff]  ;;  %v1638_v60 = vld [vmem:[%s2491_s12 + $0x50] sm:$0xff] }
 0xbf0   :  { %1615 = vmatmul.msk.f32.vlgmr.msra.gmra.mxu3 %vm291_vm9, %v1014_v4 }
 0xbf2   :  { %v1734_v3 = vpop.eup %1733 }
 0xbf3   :  { %v1081_v5 = vsel %vm291_vm9, %v1734_v3, 0.0 }
 0xbf4   :  { %1082 = vadd.xlane.f32.xlu1 %v1081_v5 }
 0xbfa   :  { %v1180_v6 = vpop.permute.xlu0 %1179 }
 0xbfb   :  { %1200 = vmatpush.msrb.mxu3 %v1180_v6 }
 0xc0d   :  { %1099 = vrot.lane.b32.xlu1 %v2314_v11, %s1949_s8 }
 0xc5c   :  { %v1163_v7 = vpop.xlane.xlu1 %1162 }
 0xc5d   :  { %1735 = vrcp.f32 %v1163_v7  ;;  %v1175_v11 = vand.u32 2147483648, %v1163_v7  ;;  %v1173_v18 = vand.u32 2147483647, %v1163_v7  ;;  %vm1169_vm10 = vweird.f32 %v1163_v7 }
 0xc5f   :  { %v1176_v20 = vor.u32 1.1754944e-38, %v1175_v11  ;;  %vm1174_vm12 = vcmp.eq.f32.partialorder %v1173_v18, 8.507059e+37 }
 0xc63   :  { %v1736_v12 = vpop.eup %1735 }
 0xc64   :  { %v1165_v14 = vmul.f32 %v1736_v12, %v1163_v7  ;;  %vm1170_vm7 = vweird.f32 %v1736_v12 }
 0xc65   :  { %vm1171_vm11 = vmor %vm1169_vm10, %vm1170_vm7 }
 0xc66   :  { %v1166_v15 = vsub.f32 1.0, %v1165_v14  ;;  %v1681_v14 = vld [vmem:[#allocation8 + $0x1] ss:$0 sm:$0xff] }
 0xc67   :  { %v1083_v16 = vpop.xlane.xlu1 %1082 }
 0xc68   :  { %v1167_v17 = vmul.f32 %v1736_v12, %v1166_v15  ;;  %1737 = vrcp.f32 %v1083_v16  ;;  %v1095_v31 = vand.u32 2147483648, %v1083_v16  ;;  %vm1089_vm14 = vweird.f32 %v1083_v16 }
 0xc69   :  { %v1093_v32 = vand.u32 2147483647, %v1083_v16 }
 0xc6a   :  { %v1168_v19 = vadd.f32 %v1736_v12, %v1167_v17  ;;  %v1096_v36 = vor.u32 1.1754944e-38, %v1095_v31 }
 0xc6b   :  { %vm1094_vm2 = vcmp.eq.f32.partialorder %v1093_v32, 8.507059e+37 }
 0xc6c   :  { %v1172_v21 = vsel %vm1171_vm11, %v1736_v12, %v1168_v19 }
 0xc6d   :  { %v1177_v23 = vsel %vm1174_vm12, %v1176_v20, %v1172_v21 }
 0xc6e   :  { %v1738_v24 = vpop.eup %1737  ;;  %v1178_v22 = vmul.f32 %v1732_v34, %v1177_v23 }
 0xc6f   :  { %v1085_v25 = vmul.f32 %v1738_v24, %v1083_v16  ;;  %vm1090_vm13 = vweird.f32 %v1738_v24  ;;  %v1682_v16 = vld [vmem:[%s2488_s9 + $0x1] ss:$0 sm:$0xff] }
 0xc70   :  { %1621 = vmatmul.msk.f32.vlgmr.msrb.gmra.mxu3 %vm291_vm9, %v1178_v22  ;;  %vm1091_vm15 = vmor %vm1089_vm14, %vm1090_vm13  ;;  %vm1472_vm14 = vcmask 1040384  }
 0xc71   :  { %v1086_v26 = vsub.f32 1.0, %v1085_v25 }
 0xc73   :  { %v1087_v27 = vmul.f32 %v1738_v24, %v1086_v26  ;;  %v1038_v29 = vpop.f32.mrf.mxu3 }
 0xc74   :  { %1042 = vrot.lane.b32.xlu0 %v1038_v29, %s1937_s29 }
 0xc75   :  { %v1088_v30 = vadd.f32 %v1738_v24, %v1087_v27 }
 0xc77   :  { %v1092_v35 = vsel %vm1091_vm15, %v1738_v24, %v1088_v30  ;;  %vm1537_vm15 = vcmask 17408  }
 0xc78   :  { %v1097_v37 = vsel %vm1094_vm2, %v1096_v36, %v1092_v35  ;;  %v1643_v35 = vld [vmem:[%s2491_s12 + $0x78] sm:$0xff]  ;;  %v1642_v36 = vld [vmem:[%s2491_s12 + $0x70] sm:$0xff] }
 0xc79   :  { %v1098_v39 = vmul.f32 %v1734_v3, %v1097_v37  ;;  %1394 = vmatpush.msrb.mxu1 %v1643_v35  ;;  %v1641_v37 = vld [vmem:[%s2491_s12 + $0x68] sm:$0xff] }
 0xc7b   :  { %1395 = vmatpush.msrb.mxu1 %v1642_v36 }
 0xc7d   :  { %1396 = vmatpush.msrb.mxu1 %v1641_v37 }
 0xc7f   :  { %v1100_v28 = vpop.permute.xlu1 %1099 }
 0xc80   :  { %1120 = vmatpush.msra.mxu2 %v1100_v28  ;;  %v1640_v28 = vld [vmem:[%s2491_s12 + $0x60] sm:$0xff] }
 0xc81   :  { %1618 = vmatmul.msk.f32.vlgmr.msra.gmra.mxu2 %vm291_vm9, %v1098_v39  ;;  %v1639_v39 = vld [vmem:[%s2491_s12 + $0x58] sm:$0xff]  ;;  %1397 = vmatpush.msrb.mxu1 %v1640_v28 }
 0xc83   :  { %1398 = vmatpush.msrb.mxu1 %v1639_v39 }
 0xc85   :  { %1399 = vmatpush.msrb.mxu1 %v1638_v60 }
 0xce6   :  { %v1043_v40 = vpop.permute.xlu0 %1042 }
 0xce7   :  { %v1045_v41 = vsel %vm263_vm8, %v2330_v52, %v1043_v40  ;;  %v1637_v40 = vld [vmem:[%s2491_s12 + $0x48] sm:$0xff] }
 0xce8   :  { %1627 = vmatmul.msk.f32.vlgmr.msrb.gmra.mxu0 %vm160_vm0, %v1045_v41  ;;  %v1636_v41 = vld [vmem:[%s2491_s12 + $0x40] sm:$0xff]  ;;  %1400 = vmatpush.msrb.mxu1 %v1637_v40  ;;  %s1570_s12 = sshll.u32 %s2517_s1, 4  ;;  %s1571_s12 = int_to_ptr.hbm [resolvable:$true] %s1570_s12 }
 0xcea   :  { %1401 = vmatpush.msrb.mxu1 %v1636_v41 }
 0xcf3   :  { %v1202_v42 = vpop.f32.mrf.mxu3 }
 0xcf4   :  { %1206 = vrot.lane.b32.xlu2 %v1202_v42, %s1937_s29  ;;  %v1683_v42 = vld [vmem:[#allocation10 + $0x1] ss:$0 sm:$0xff] }
 0xd04   :  { %v1122_v43 = vpop.f32.mrf.mxu2 }
 0xd4e   :  { %v1207_v44 = vpop.permute.xlu2 %1206 }
 0xd4f   :  { %v1209_v45 = vsel %vm263_vm8, %v1122_v43, %v1207_v44 }
 0xd50   :  { %1628 = vmatmul.msk.f32.gmra.mxu0 %vm160_vm0, %v1209_v45 }
 0xd65   :  { %v1243_v46 = vpop.f32.mrf.mxu0 }
 0xd66   :  { %v1244_v47 = vadd.f32 %v1680_v50, %v1243_v46 }
 0xd68   :  { %v1249_v48 = vadd.f32 %v1244_v47, %v2280_v33 }
 0xd6a   :  { %v1255_v52 = vsel %vm160_vm0, %v1249_v48, 0.0 }
 0xd6b   :  { %1256 = vadd.xlane.f32.xlu0 %v1255_v52 }
 0xdcd   :  { %v1246_v49 = vpop.f32.mrf.mxu0 }
 0xdce   :  { %v1247_v51 = vadd.f32 %v1680_v50, %v1246_v49 }
 0xdd0   :  { %v1250_v53 = vadd.f32 %v1247_v51, %v2308_v1  ;;  %v1633_v1 = vld [vmem:[%s2489_s10 + $0x38] sm:$0xff] }
 0xdd1   :  { %1337 = vmatpush.msrb.mxu2 %v1633_v1  ;;  %v1684_v1 = vld [vmem:[%s2492_s13 + $0x1] ss:$0 sm:$0xff] }
 0xdd2   :  { %v1258_v34 = vsel %vm160_vm0, %v1250_v53, 0.0 }
 0xdd3   :  { %1259 = vadd.xlane.f32.xlu2 %v1258_v34  ;;  %1338 = vmatpush.msrb.mxu2 %v1632_v63 }
 0xdd5   :  { %1339 = vmatpush.msrb.mxu2 %v1631_v0 }
 0xdd7   :  { %1340 = vmatpush.msrb.mxu2 %v1630_v2 }
 0xdde   :  { %v1257_v54 = vpop.xlane.xlu0 %1256 }
 0xddf   :  { %v1261_v55 = vmul.f32 %v1257_v54, %v2086_v10 }
 0xde1   :  { %v1263_v56 = vsub.f32 %v1249_v48, %v1261_v55 }
 0xde3   :  { %v1265_v57 = vmul.f32 %v1263_v56, %v1263_v56 }
 0xde5   :  { %v1267_v38 = vsel %vm160_vm0, %v1265_v57, 0.0 }
 0xde6   :  { %1268 = vadd.xlane.f32.xlu1 %v1267_v38 }
 0xe46   :  { %v1260_v58 = vpop.xlane.xlu2 %1259 }
 0xe47   :  { %v1262_v33 = vmul.f32 %v1260_v58, %v2086_v10 }
 0xe49   :  { %v1264_v59 = vsub.f32 %v1250_v53, %v1262_v33 }
 0xe4b   :  { %v1266_v61 = vmul.f32 %v1264_v59, %v1264_v59 }
 0xe4d   :  { %v1270_v62 = vsel %vm160_vm0, %v1266_v61, 0.0 }
 0xe4e   :  { %1271 = vadd.xlane.f32.xlu2 %v1270_v62 }
 0xe59   :  { %v1269_v4 = vpop.xlane.xlu1 %1268 }
 0xe5a   :  { %v1273_v3 = vmul.f32 %v1269_v4, %v2086_v10 }
 0xe5c   :  { %v1275_v5 = vadd.f32 1e-12, %v1273_v3 }
 0xe5e   :  { %1739 = vrsqrt.f32 %v1275_v5  ;;  %vm1283_vm9 = vweird.f32 %v1275_v5 }
 0xe64   :  { %v1740_v6 = vpop.eup %1739 }
 0xe65   :  { %v1278_v7 = vmul.f32 %v1740_v6, %v1275_v5  ;;  %vm1284_vm8 = vweird.f32 %v1740_v6 }
 0xe66   :  { %vm1285_vm3 = vmor %vm1283_vm9, %vm1284_vm8 }
 0xe67   :  { %v1279_v8 = vmul.f32 %v1740_v6, %v1278_v7 }
 0xe69   :  { %v1280_v9 = vmul.f32 0.5, %v1279_v8 }
 0xe6b   :  { %v1281_v12 = vsub.f32 1.5, %v1280_v9 }
 0xe6d   :  { %v1282_v13 = vmul.f32 %v1740_v6, %v1281_v12 }
 0xe6f   :  { %v1286_v15 = vsel %vm1285_vm3, %v1740_v6, %v1282_v13 }
 0xe70   :  { %v1297_v11 = vmul.f32 %v1286_v15, %v1263_v56 }
 0xe72   :  { %v1302_v17 = vmul.f32 %v1681_v14, %v1297_v11 }
 0xe74   :  { %v2394_v18 = vadd.f32 %v1682_v16, %v1302_v17 }
 0xe76   :  { %1634 = vmatmul.msk.f32.vlgmr.msrb.gmra.mxu2 %vm160_vm0, %v2394_v18 }
 0xec1   :  { %v1272_v19 = vpop.xlane.xlu2 %1271 }
 0xec2   :  { %v1274_v20 = vmul.f32 %v1272_v19, %v2086_v10 }
 0xec4   :  { %v1276_v21 = vadd.f32 1e-12, %v1274_v20 }
 0xec6   :  { %1741 = vrsqrt.f32 %v1276_v21  ;;  %vm1293_vm5 = vweird.f32 %v1276_v21 }
 0xecc   :  { %v1742_v23 = vpop.eup %1741 }
 0xecd   :  { %v1288_v24 = vmul.f32 %v1742_v23, %v1276_v21  ;;  %vm1294_vm4 = vweird.f32 %v1742_v23 }
 0xece   :  { %vm1295_vm6 = vmor %vm1293_vm5, %vm1294_vm4 }
 0xecf   :  { %v1289_v22 = vmul.f32 %v1742_v23, %v1288_v24  ;;  %v1476_v24 = vld [vmem:[%s2495_s16 + $0x10] sm:$0xff] }
 0xed1   :  { %v1290_v25 = vmul.f32 0.5, %v1289_v22 }
 0xed3   :  { %v1291_v26 = vsub.f32 1.5, %v1290_v25  ;;  %v1475_v25 = vld [vmem:[%s2495_s16 + $0x8] sm:$0xff] }
 0xed5   :  { %v1292_v27 = vmul.f32 %v1742_v23, %v1291_v26  ;;  %v1474_v26 = vld [vmem:[%s2495_s16] sm:$0xff] }
 0xed7   :  { %v1296_v29 = vsel %vm1295_vm6, %v1742_v23, %v1292_v27  ;;  %v1477_v23 = vld [vmem:[%s2495_s16 + $0x18] sm:$0xff] }
 0xed8   :  { %v1298_v30 = vmul.f32 %v1296_v29, %v1264_v59  ;;  %1497 = vmatpush.msra.mxu3 %v1477_v23 }
 0xeda   :  { %v1303_v31 = vmul.f32 %v1681_v14, %v1298_v30  ;;  %1498 = vmatpush.msra.mxu3 %v1476_v24 }
 0xedc   :  { %v1308_v32 = vadd.f32 %v1682_v16, %v1303_v31  ;;  %1499 = vmatpush.msra.mxu3 %v1475_v25 }
 0xede   :  { %1635 = vmatmul.msk.f32.gmra.mxu2 %vm160_vm0, %v1308_v32  ;;  %1500 = vmatpush.msra.mxu3 %v1474_v26 }
 0xef9   :  { %v1342_v43 = vpop.f32.mrf.mxu2 }
 0xefa   :  { %v1343_v44 = vadd.f32 %v1683_v42, %v1342_v43 }
 0xefc   :  { %v1350_v45 = vmul.f32 0.044715, %v1343_v44  ;;  %v1348_v49 = vmul.f32 0.5, %v1343_v44 }
 0xefe   :  { %v1352_v50 = vmul.f32 %v1350_v45, %v1343_v44 }
 0xf00   :  { %v1354_v46 = vmul.f32 %v1352_v50, %v1343_v44 }
 0xf02   :  { %v1356_v47 = vadd.f32 %v1354_v46, %v1343_v44  ;;  %v1685_v44 = vld [vmem:[#allocation11 + $0x1] ss:$0 sm:$0xff] }
 0xf04   :  { %v1358_v48 = vmul.f32 0.7978846, %v1356_v47 }
 0xf06   :  { %1743 = vtanh.f32 %v1358_v48  ;;  %v1686_v48 = vld [vmem:[%s2494_s15 + $0x1] ss:$0 sm:$0xff] }
 0xf0c   :  { %v1744_v52 = vpop.eup %1743 }
 0xf0d   :  { %v1362_v51 = vadd.f32 1.0, %v1744_v52 }
 0xf0f   :  { %v1364_v53 = vmul.f32 %v1362_v51, %v1348_v49 }
 0xf11   :  { %1645 = vmatmul.msk.f32.vlgmr.msrb.gmra.mxu1 %vm755_vm1, %v1364_v53 }
 0xf61   :  { %v1345_v34 = vpop.f32.mrf.mxu2 }
 0xf62   :  { %v1346_v54 = vadd.f32 %v1683_v42, %v1345_v34  ;;  %v1509_v34 = vld [vmem:[%s2497_s18 + $0x18] sm:$0xff] }
 0xf63   :  { %1529 = vmatpush.msrb.mxu3 %v1509_v34 }
 0xf64   :  { %v1351_v55 = vmul.f32 0.044715, %v1346_v54  ;;  %v1349_v59 = vmul.f32 0.5, %v1346_v54 }
 0xf66   :  { %v1353_v56 = vmul.f32 %v1351_v55, %v1346_v54  ;;  %v1507_v55 = vld [vmem:[%s2497_s18 + $0x8] sm:$0xff] }
 0xf68   :  { %v1355_v57 = vmul.f32 %v1353_v56, %v1346_v54  ;;  %v1506_v56 = vld [vmem:[%s2497_s18] sm:$0xff] }
 0xf6a   :  { %v1357_v38 = vadd.f32 %v1355_v57, %v1346_v54  ;;  %v1508_v54 = vld [vmem:[%s2497_s18 + $0x10] sm:$0xff]  ;;  %v1687_v57 = vld [vmem:[%s2515_s4] ss:$0 sm:$0xff]  ;;  %s1951_s18 = smov [#allocation13]  }
 0xf6b   :  { %1530 = vmatpush.msrb.mxu3 %v1508_v54  ;;  %s1568_s8 = sshll.u32 %s1951_s18, 4  ;;  %s1569_s8 = int_to_ptr.vmem [resolvable:$true] %s1568_s8 }
 0xf6c   :  { %v1359_v58 = vmul.f32 0.7978846, %v1357_v38 }
 0xf6d   :  { %1531 = vmatpush.msrb.mxu3 %v1507_v55 }
 0xf6e   :  { %1745 = vtanh.f32 %v1359_v58 }
 0xf6f   :  { %1532 = vmatpush.msrb.mxu3 %v1506_v56 }
 0xf74   :  { %v1746_v33 = vpop.eup %1745 }
 0xf75   :  { %v1363_v61 = vadd.f32 1.0, %v1746_v33 }
 0xf77   :  { %v1365_v62 = vmul.f32 %v1363_v61, %v1349_v59  ;;  %v1688_v59 = vld [vmem:[%s2516_s26] ss:$0 sm:$0xff] }
 0xf79   :  { %1646 = vmatmul.msk.f32.gmra.mxu1 %vm755_vm1, %v1365_v62 }
 0xf8e   :  { %v1403_v63 = vpop.f32.mrf.mxu1 }
 0xf8f   :  { %v1404_v0 = vadd.f32 %v1684_v1, %v1403_v63 }
 0xf91   :  { %v1409_v2 = vadd.f32 %v1404_v0, %v2394_v18 }
 0xf93   :  { %v1415_v4 = vsel %vm160_vm0, %v1409_v2, 0.0 }
 0xf94   :  { %1416 = vadd.xlane.f32.xlu1 %v1415_v4 }
 0xff6   :  { %v1406_v3 = vpop.f32.mrf.mxu1 }
 0xff7   :  { %v1407_v5 = vadd.f32 %v1684_v1, %v1406_v3 }
 0xff9   :  { %v1410_v6 = vadd.f32 %v1407_v5, %v1308_v32 }
 0xffb   :  { %v1418_v7 = vsel %vm160_vm0, %v1410_v6, 0.0 }
 0xffc   :  { %1419 = vadd.xlane.f32.xlu0 %v1418_v7 }
0x1007   :  { %v1417_v8 = vpop.xlane.xlu1 %1416 }
0x1008   :  { %v1421_v9 = vmul.f32 %v1417_v8, %v2086_v10 }
0x100a   :  { %v1423_v12 = vsub.f32 %v1409_v2, %v1421_v9 }
0x100c   :  { %v1425_v13 = vmul.f32 %v1423_v12, %v1423_v12 }
0x100e   :  { %v1427_v14 = vsel %vm160_vm0, %v1425_v13, 0.0 }
0x100f   :  { %1428 = vadd.xlane.f32.xlu0 %v1427_v14 }
0x106f   :  { %v1420_v15 = vpop.xlane.xlu0 %1419 }
0x1070   :  { %v1422_v11 = vmul.f32 %v1420_v15, %v2086_v10 }
0x1072   :  { %v1424_v16 = vsub.f32 %v1410_v6, %v1422_v11 }
0x1074   :  { %v1426_v17 = vmul.f32 %v1424_v16, %v1424_v16 }
0x1076   :  { %v1430_v18 = vsel %vm160_vm0, %v1426_v17, 0.0 }
0x1077   :  { %1431 = vadd.xlane.f32.xlu2 %v1430_v18 }
0x1082   :  { %v1429_v19 = vpop.xlane.xlu0 %1428 }
0x1083   :  { %v1433_v20 = vmul.f32 %v1429_v19, %v2086_v10 }
0x1085   :  { %v1435_v21 = vadd.f32 1e-12, %v1433_v20 }
0x1087   :  { %1747 = vrsqrt.f32 %v1435_v21  ;;  %vm1443_vm7 = vweird.f32 %v1435_v21 }
0x108d   :  { %v1748_v22 = vpop.eup %1747 }
0x108e   :  { %v1438_v27 = vmul.f32 %v1748_v22, %v1435_v21  ;;  %vm1444_vm1 = vweird.f32 %v1748_v22 }
0x108f   :  { %vm1445_vm10 = vmor %vm1443_vm7, %vm1444_vm1 }
0x1090   :  { %v1439_v31 = vmul.f32 %v1748_v22, %v1438_v27 }
0x1092   :  { %v1440_v35 = vmul.f32 0.5, %v1439_v31 }
0x1094   :  { %v1441_v36 = vsub.f32 1.5, %v1440_v35 }
0x1096   :  { %v1442_v39 = vmul.f32 %v1748_v22, %v1441_v36 }
0x1098   :  { %v1446_v41 = vsel %vm1445_vm10, %v1748_v22, %v1442_v39 }
0x10ea   :  { %v1432_v29 = vpop.xlane.xlu2 %1431 }
0x10eb   :  { %v1434_v30 = vmul.f32 %v1432_v29, %v2086_v10  ;;  %v1457_v10 = vmul.f32 %v1446_v41, %v1423_v12 }
0x10ed   :  { %v1436_v32 = vadd.f32 1e-12, %v1434_v30  ;;  %v1462_v46 = vmul.f32 %v1685_v44, %v1457_v10 }
0x10ef   :  { %1749 = vrsqrt.f32 %v1436_v32  ;;  %vm1453_vm12 = vweird.f32 %v1436_v32  ;;  %v1467_v49 = vadd.f32 %v1686_v48, %v1462_v46 }
0x10f5   :  { %v1750_v37 = vpop.eup %1749 }
0x10f6   :  { %v1448_v28 = vmul.f32 %v1750_v37, %v1436_v32  ;;  %vm1454_vm11 = vweird.f32 %v1750_v37 }
0x10f7   :  { %vm1455_vm13 = vmor %vm1453_vm12, %vm1454_vm11 }
0x10f8   :  { %v1449_v60 = vmul.f32 %v1750_v37, %v1448_v28 }
0x10fa   :  { %v1450_v40 = vmul.f32 0.5, %v1449_v60 }
0x10fc   :  { %v1451_v42 = vsub.f32 1.5, %v1450_v40 }
0x10fe   :  { %v1452_v43 = vmul.f32 %v1750_v37, %v1451_v42 }
0x1100   :  { %v1456_v45 = vsel %vm1455_vm13, %v1750_v37, %v1452_v43 }
0x1101   :  { %v1458_v50 = vmul.f32 %v1456_v45, %v1424_v16 }
0x1103   :  { %v1463_v47 = vmul.f32 %v1685_v44, %v1458_v50 }
0x1105   :  { %v1468_v52 = vadd.f32 %v1686_v48, %v1463_v47 }
0x1107   :  { %v1470_v51 = vrot.slane %v1468_v52, 7 }
0x1109   :  { %v1473_v53 = vsel %vm1472_vm14, %v1467_v49, %v1470_v51 }
0x110a   :  { %1648 = vmatmul.msk.f32.vlgmr.msra.gmra.mxu3 %vm160_vm0, %v1473_v53 }
0x118d   :  { %v1502_v38 = vpop.f32.mrf.mxu3 }
0x118e   :  { %v1503_v58 = vadd.f32 %v1687_v57, %v1502_v38 }
0x1190   :  { %1751 = vtanh.f32 %v1503_v58 }
0x1196   :  { %v1752_v33 = vpop.eup %1751 }
0x1197   :  { %1649 = vmatmul.msk.f32.vlgmr.msrb.gmra.mxu3 %vm160_vm0, %v1752_v33 }
0x121a   :  { %v1534_v61 = vpop.f32.mrf.mxu3 }
0x121b   :  { %v1535_v62 = vadd.f32 %v1688_v59, %v1534_v61 }
0x121d   :  { %v1538_v1 = vsel %vm1537_vm15, %v1535_v62, -inf }
0x121e   :  { %1539 = vmax.xlane.f32.xlu1 %v1538_v1 }
0x1291   :  { %v1540_v63 = vpop.xlane.xlu1 %1539 }
0x1292   :  { %v1541_v0 = vsub.f32 %v1535_v62, %v1540_v63 }
0x1294   :  { %v1542_v2 = vmul.f32 1.442695, %v1541_v0 }
0x1296   :  { %1753 = vpow2.f32 %v1542_v2 }
0x129c   :  { %v1754_v4 = vpop.eup %1753 }
0x129d   :  { %v1544_v3 = vsel %vm1537_vm15, %v1754_v4, 0.0 }
0x129e   :  { %1545 = vadd.xlane.f32.xlu2 %v1544_v3 }
0x1311   :  { %v1546_v5 = vpop.xlane.xlu2 %1545 }
0x1312   :  { %1755 = vrcp.f32 %v1546_v5  ;;  %v1558_v9 = vand.u32 2147483648, %v1546_v5  ;;  %v1556_v13 = vand.u32 2147483647, %v1546_v5  ;;  %vm1552_vm2 = vweird.f32 %v1546_v5 }
0x1314   :  { %v1559_v15 = vor.u32 1.1754944e-38, %v1558_v9  ;;  %vm1557_vm9 = vcmp.eq.f32.partialorder %v1556_v13, 8.507059e+37 }
0x1318   :  { %v1756_v6 = vpop.eup %1755 }
0x1319   :  { %v1548_v7 = vmul.f32 %v1756_v6, %v1546_v5  ;;  %vm1553_vm0 = vweird.f32 %v1756_v6 }
0x131a   :  { %vm1554_vm8 = vmor %vm1552_vm2, %vm1553_vm0 }
0x131b   :  { %v1549_v8 = vsub.f32 1.0, %v1548_v7 }
0x131d   :  { %v1550_v12 = vmul.f32 %v1756_v6, %v1549_v8 }
0x131f   :  { %v1551_v14 = vadd.f32 %v1756_v6, %v1550_v12 }
0x1321   :  { %v1555_v11 = vsel %vm1554_vm8, %v1756_v6, %v1551_v14 }
0x1322   :  { %v1560_v16 = vsel %vm1557_vm9, %v1559_v15, %v1555_v11 }
0x1323   :  { %v1561_v17 = vmul.f32 %v1754_v4, %v1560_v16 }
0x1325   :  { %1562 = vst.msk [vmem:[#allocation13] sm:$0x3] %vm1537_vm15, %v1561_v17 }
0x1326   :  { %1573 = dma.vmem_to_hbm [thread:$0]  %s1569_s8, 32, %s1571_s12, [#allocation4]  }
0x1327   :  { %1933 = dma.done.wait [#allocation4], 32  }
0x1328   :  { %1934 = vsyncadd [#allocation4], 4294967264 }
0x1329   :  { %1578 = vsyncpa [#allocation3], 1 }
0x132a   :  { %1579 = vsyncpa [#allocation6], 1 }
0x132b   :  { %1580 = vsyncpa [#allocation9], 1 }
0x132c   :  { %1581 = vsyncpa [#allocation12], 1 }
0x132d   :  { %1582 = vsyncpa [#allocation4], 1 }

</bundles_post_ra>
